<compile_context>
chip_gen: v5e
topology: v5e:2x2
jax: 0.10.0
libtpu: 0.0.40
codegen_flags: <defaults>
</compile_context>

<pallas_src>
import jax
import jax.numpy as jnp
import numpy as np
from jax.experimental import pallas as pl
from jax.experimental.pallas import tpu as pltpu


_TINY_BYTES = 256 * 1024      # below this, XLA's fused concat wins outright
_LANE = 128                   # vreg / HBM tile lane width


def _round_up(x, m):
    return ((x + m - 1) // m) * m


def _sublane(dtype):
    # f32 -> 8 rows/vreg, bf16 -> 16, int8/fp8 -> 32 (sub-32-bit packs along sublanes)
    return max(8, 32 // jnp.dtype(dtype).itemsize)


def _vmem_capacity_bytes():
    try:
        return int(pltpu.get_tpu_info().vmem_capacity_bytes)
    except Exception:
        return 64 << 20       # conservative default (v7x per-TC VMEM)


# ---------------------------------------------------------------------------
# Path 2: direct HBM->HBM DMA concat (all column windows 128-lane aligned).
# ---------------------------------------------------------------------------
def _build_dma_concat_kernel(widths):
    n_in = len(widths)
    offsets = []
    off = 0
    for w in widths:
        offsets.append(off)
        off += w

    def kernel(*refs):
        in_refs = refs[:n_in]
        out_ref = refs[n_in]
        sem = refs[n_in + 1]
        copies = []
        for k in range(n_in):
            o, w = offsets[k], widths[k]
            cp = pltpu.make_async_copy(
                in_refs[k],                   # full (outer, w_k) HBM source
                out_ref.at[:, o:o + w],       # strided column window of the output
                sem.at[k])
            cp.start()
            copies.append(cp)
        for cp in copies:                     # all K DMAs stream concurrently
            cp.wait()

    return kernel


def _concat_direct_dma(flat, widths, outer, total, dtype):
    itemsize = jnp.dtype(dtype).itemsize
    kernel = _build_dma_concat_kernel([int(w) for w in widths])
    return pl.pallas_call(
        kernel,
        out_shape=jax.ShapeDtypeStruct((outer, total), dtype),
        in_specs=[pl.BlockSpec(memory_space=pl.ANY)] * len(flat),
        out_specs=pl.BlockSpec(memory_space=pl.ANY),
        scratch_shapes=[pltpu.SemaphoreType.DMA((len(flat),))],
        cost_estimate=pl.CostEstimate(
            flops=0, transcendentals=0,
            bytes_accessed=2 * outer * total * itemsize),
    )(*flat)


# ---------------------------------------------------------------------------
# Path 3: row-tiled VMEM copy concat (handles arbitrary, unaligned widths).
# ---------------------------------------------------------------------------
def _concat_rows_kernel(*refs):
    """Copy each (tm, w_k) input tile into its static column window of the
    (tm, sum_k w_k) output tile.  Pure VMEM data movement."""
    *in_refs, out_ref = refs
    off = 0
    for r in in_refs:
        w = r.shape[1]
        out_ref[:, off:off + w] = r[...]
        off += w


def _concat_rows_pallas(flat, widths, outer, total, dtype):
    itemsize = jnp.dtype(dtype).itemsize
    sub = _sublane(dtype)
    cap = _vmem_capacity_bytes()
    # ~48 MiB limit on v7x (64 MiB physical), ~96 MiB on v5e/v6e (128 MiB).
    vmem_limit = int(min(cap * 3 // 4, 96 << 20))
    budget = vmem_limit // 2                      # headroom for Mosaic scratch
    row_bytes = total * itemsize

    # in + out tiles, double-buffered -> 4 * tm * row_bytes must fit the budget.
    tm_budget = (budget // (4 * row_bytes) // sub) * sub
    if tm_budget < sub:
        return None                               # cannot tile this shape safely
    tm = min(tm_budget, 4096)
    if outer >= 2 * sub:
        # Prefer >= 2 row tiles so the "parallel" axis shards across v7x's 2 TCs.
        tm = min(tm, _round_up((outer + 1) // 2, sub))
    if tm >= outer:
        tm = outer                                # single full-height block
    grid = (pl.cdiv(outer, tm),)

    return pl.pallas_call(
        _concat_rows_kernel,
        out_shape=jax.ShapeDtypeStruct((outer, total), dtype),
        grid=grid,
        in_specs=[pl.BlockSpec((tm, int(w)), lambda i: (i, 0)) for w in widths],
        out_specs=pl.BlockSpec((tm, total), lambda i: (i, 0)),
        compiler_params=pltpu.CompilerParams(
            dimension_semantics=("parallel",),
            vmem_limit_bytes=vmem_limit),
        cost_estimate=pl.CostEstimate(
            flops=0, transcendentals=0,
            bytes_accessed=2 * outer * row_bytes),
    )(*flat)


# ---------------------------------------------------------------------------
# Public concat + ConcatEncoder forward.
# ---------------------------------------------------------------------------
def concat_pallas(arrays, dim):
    """jnp.concatenate(arrays, axis=dim), Pallas-accelerated for large inputs."""
    arrays = [jnp.asarray(a) for a in arrays]
    if len(arrays) == 1:
        return arrays[0]
    nd = arrays[0].ndim
    axis = dim % nd
    lead = arrays[0].shape[:axis]
    trail = arrays[0].shape[axis + 1:]
    dtype = arrays[0].dtype
    for a in arrays:
        assert a.ndim == nd and a.shape[:axis] == lead and a.shape[axis + 1:] == trail, (
            "concat inputs must match on all non-concat dims")
        assert a.dtype == dtype, "concat inputs must share a dtype"

    outer = int(np.prod(lead)) if lead else 1
    inner = int(np.prod(trail)) if trail else 1
    widths = [int(a.shape[axis]) * inner for a in arrays]
    total = int(sum(widths))
    out_axis = sum(int(a.shape[axis]) for a in arrays)
    out_shape = lead + (out_axis,) + trail

    itemsize = jnp.dtype(dtype).itemsize
    out_bytes = outer * total * itemsize

    # Path 1: tiny / awkward inputs -> XLA's fused concat is strictly faster.
    if out_bytes < _TINY_BYTES or dtype == jnp.bool_ or min(widths) == 0:
        return jnp.concatenate(arrays, axis=axis)

    flat = [a.reshape(outer, w) for a, w in zip(arrays, widths)]

    # Path 2: every column window is 128-lane aligned -> one strided HBM->HBM
    # DMA per input; no VMEM bounce, no masked vector stores.
    if all(w % _LANE == 0 for w in widths):
        try:
            out = _concat_direct_dma(flat, widths, outer, total, dtype)
            return out.reshape(out_shape)
        except Exception:
            pass  # fall through to the (previously validated) tiled copy path

    # Path 3: row-tiled, auto-pipelined VMEM copy.
    out = _concat_rows_pallas(flat, widths, outer, total, dtype)
    if out is None:  # shape cannot be row-tiled within the VMEM budget
        return jnp.concatenate(arrays, axis=axis)
    return out.reshape(out_shape)


def concat_encoder_forward(inputs, input_prefixes, dim, output_prefix, concat_masks=True):
    """Dict-based equivalent of ConcatEncoder.forward()."""
    embeddings = [inputs[p] for p in input_prefixes]
    inputs[output_prefix] = concat_pallas(embeddings, dim)
    if concat_masks:
        # Masks are tiny relative to the embeddings: per the performance review
        # they go straight through XLA's fused concat (no extra pallas_call,
        # no bool<->int round trip).
        masks = [jnp.asarray(inputs[f"{p}.mask"]) for p in input_prefixes]
        inputs[f"{output_prefix}.mask"] = jnp.concatenate(masks, axis=dim)
    return inputs


if __name__ == "__main__":
    key = jax.random.PRNGKey(0)
    keys = jax.random.split(key, 8)

    # --- ConcatEncoder demo at small module-like shapes (tiny fast path) ---
    B, S = 2, 8
    D1, D2, D3 = 32, 64, 32
    a = jax.random.normal(keys[0], (B, S, D1), dtype=jnp.float32)
    b = jax.random.normal(keys[1], (B, S, D2), dtype=jnp.float32)
    c = jax.random.normal(keys[2], (B, S, D3), dtype=jnp.float32)
    ma = jax.random.bernoulli(keys[3], 0.7, (B, S))
    mb = jnp.ones((B, S), dtype=jnp.bool_)
    mc = jax.random.bernoulli(keys[4], 0.5, (B, S))
    inputs = {"a": a, "a.mask": ma, "b": b, "b.mask": mb, "c": c, "c.mask": mc}

    concat_encoder_forward(inputs, ["a", "b", "c"], dim=-1, output_prefix="cat")
    emb = jax.block_until_ready(inputs["cat"])
    msk = jax.block_until_ready(inputs["cat.mask"])
    ref_emb = np.concatenate([np.asarray(a), np.asarray(b), np.asarray(c)], axis=-1)
    ref_msk = np.concatenate([np.asarray(ma), np.asarray(mb), np.asarray(mc)], axis=-1)
    assert emb.shape == (B, S, D1 + D2 + D3) and emb.dtype == a.dtype
    assert np.array_equal(np.asarray(emb), ref_emb), "embedding concat mismatch"
    assert msk.dtype == jnp.bool_ and np.array_equal(np.asarray(msk), ref_msk), "mask concat mismatch"

    # --- lane-aligned widths -> direct HBM->HBM DMA kernel (path 2) ---
    x1 = jax.random.normal(keys[5], (8, 128, 128), dtype=jnp.float32)
    x2 = jax.random.normal(keys[6], (8, 128, 256), dtype=jnp.float32)
    x3 = jax.random.normal(keys[7], (8, 128, 128), dtype=jnp.float32)
    y = jax.block_until_ready(concat_pallas([x1, x2, x3], dim=-1))
    assert np.array_equal(
        np.asarray(y),
        np.concatenate([np.asarray(x1), np.asarray(x2), np.asarray(x3)], axis=-1)), \
        "aligned (DMA) concat mismatch"

    # --- unaligned widths + non-divisible rows -> row-tiled copy kernel (path 3),
    #     exercising a partial last block ---
    u1 = jax.random.normal(keys[0], (2061, 96), dtype=jnp.float32)
    u2 = jax.random.normal(keys[1], (2061, 160), dtype=jnp.float32)
    z = jax.block_until_ready(concat_pallas([u1, u2], dim=-1))
    assert np.array_equal(
        np.asarray(z),
        np.concatenate([np.asarray(u1), np.asarray(u2)], axis=-1)), \
        "unaligned (tiled) concat mismatch"

    # --- concat along a middle dim exercises the generic (outer, c_k*inner) reduction ---
    s = jax.block_until_ready(concat_pallas([a, c], dim=1))
    assert np.array_equal(
        np.asarray(s),
        np.concatenate([np.asarray(a), np.asarray(c)], axis=1)), "dim=1 concat mismatch"

    print("KERNEL_OK")
</pallas_src>

<mosaic_0001>
module attributes {stable_mosaic.version = 11 : i64} {
  func.func @kernel(%arg0: memref<1024x128xf32, #tpu.memory_space<any>>, %arg1: memref<1024x256xf32, #tpu.memory_space<any>>, %arg2: memref<1024x128xf32, #tpu.memory_space<any>>, %arg3: memref<1024x512xf32, #tpu.memory_space<any>>, %arg4: memref<3x!tpu.dma_semaphore, #tpu.memory_space<semaphore_mem>>) attributes {dimension_semantics = [], scalar_prefetch = 0 : i64, scratch_operands = 1 : i64, tpu.core_type = #tpu.core_type<tc>} {
    %c0_i32 = arith.constant 0 : i32
    %c0_i32_0 = arith.constant 0 : i32
    %c0_i32_1 = arith.constant 0 : i32
    %0 = tpu.memref_slice %arg3[%c0_i32_0, %c0_i32_1] : memref<1024x512xf32, #tpu.memory_space<any>> -> memref<1024x128xf32, #tpu.memory_space<any>>
    %1 = tpu.memref_slice %arg4[%c0_i32] : memref<3x!tpu.dma_semaphore, #tpu.memory_space<semaphore_mem>> -> memref<1x!tpu.dma_semaphore, #tpu.memory_space<semaphore_mem>>
    %2 = tpu.memref_squeeze %1 : memref<1x!tpu.dma_semaphore, #tpu.memory_space<semaphore_mem>> -> memref<!tpu.dma_semaphore, #tpu.memory_space<semaphore_mem>>
    tpu.enqueue_dma source(%arg0 : memref<1024x128xf32, #tpu.memory_space<any>>) target(%0 : memref<1024x128xf32, #tpu.memory_space<any>>) target_semaphore(%2 : memref<!tpu.dma_semaphore, #tpu.memory_space<semaphore_mem>>)
    %c1_i32 = arith.constant 1 : i32
    %c0_i32_2 = arith.constant 0 : i32
    %c128_i32 = arith.constant 128 : i32
    %3 = tpu.memref_slice %arg3[%c0_i32_2, %c128_i32] : memref<1024x512xf32, #tpu.memory_space<any>> -> memref<1024x256xf32, #tpu.memory_space<any>>
    %4 = tpu.memref_slice %arg4[%c1_i32] : memref<3x!tpu.dma_semaphore, #tpu.memory_space<semaphore_mem>> -> memref<1x!tpu.dma_semaphore, #tpu.memory_space<semaphore_mem>>
    %5 = tpu.memref_squeeze %4 : memref<1x!tpu.dma_semaphore, #tpu.memory_space<semaphore_mem>> -> memref<!tpu.dma_semaphore, #tpu.memory_space<semaphore_mem>>
    tpu.enqueue_dma source(%arg1 : memref<1024x256xf32, #tpu.memory_space<any>>) target(%3 : memref<1024x256xf32, #tpu.memory_space<any>>) target_semaphore(%5 : memref<!tpu.dma_semaphore, #tpu.memory_space<semaphore_mem>>)
    %c2_i32 = arith.constant 2 : i32
    %c0_i32_3 = arith.constant 0 : i32
    %c384_i32 = arith.constant 384 : i32
    %6 = tpu.memref_slice %arg3[%c0_i32_3, %c384_i32] : memref<1024x512xf32, #tpu.memory_space<any>> -> memref<1024x128xf32, #tpu.memory_space<any>>
    %7 = tpu.memref_slice %arg4[%c2_i32] : memref<3x!tpu.dma_semaphore, #tpu.memory_space<semaphore_mem>> -> memref<1x!tpu.dma_semaphore, #tpu.memory_space<semaphore_mem>>
    %8 = tpu.memref_squeeze %7 : memref<1x!tpu.dma_semaphore, #tpu.memory_space<semaphore_mem>> -> memref<!tpu.dma_semaphore, #tpu.memory_space<semaphore_mem>>
    tpu.enqueue_dma source(%arg2 : memref<1024x128xf32, #tpu.memory_space<any>>) target(%6 : memref<1024x128xf32, #tpu.memory_space<any>>) target_semaphore(%8 : memref<!tpu.dma_semaphore, #tpu.memory_space<semaphore_mem>>)
    %c0_i32_4 = arith.constant 0 : i32
    %c0_i32_5 = arith.constant 0 : i32
    %c0_i32_6 = arith.constant 0 : i32
    %9 = tpu.memref_slice %arg3[%c0_i32_5, %c0_i32_6] : memref<1024x512xf32, #tpu.memory_space<any>> -> memref<1024x128xf32, #tpu.memory_space<any>>
    %10 = tpu.memref_slice %arg4[%c0_i32_4] : memref<3x!tpu.dma_semaphore, #tpu.memory_space<semaphore_mem>> -> memref<1x!tpu.dma_semaphore, #tpu.memory_space<semaphore_mem>>
    %11 = tpu.memref_squeeze %10 : memref<1x!tpu.dma_semaphore, #tpu.memory_space<semaphore_mem>> -> memref<!tpu.dma_semaphore, #tpu.memory_space<semaphore_mem>>
    tpu.wait_dma2 semaphore(%11 : memref<!tpu.dma_semaphore, #tpu.memory_space<semaphore_mem>>) src(%arg0 : memref<1024x128xf32, #tpu.memory_space<any>>) dst(%9 : memref<1024x128xf32, #tpu.memory_space<any>>)
    %c1_i32_7 = arith.constant 1 : i32
    %c0_i32_8 = arith.constant 0 : i32
    %c128_i32_9 = arith.constant 128 : i32
    %12 = tpu.memref_slice %arg3[%c0_i32_8, %c128_i32_9] : memref<1024x512xf32, #tpu.memory_space<any>> -> memref<1024x256xf32, #tpu.memory_space<any>>
    %13 = tpu.memref_slice %arg4[%c1_i32_7] : memref<3x!tpu.dma_semaphore, #tpu.memory_space<semaphore_mem>> -> memref<1x!tpu.dma_semaphore, #tpu.memory_space<semaphore_mem>>
    %14 = tpu.memref_squeeze %13 : memref<1x!tpu.dma_semaphore, #tpu.memory_space<semaphore_mem>> -> memref<!tpu.dma_semaphore, #tpu.memory_space<semaphore_mem>>
    tpu.wait_dma2 semaphore(%14 : memref<!tpu.dma_semaphore, #tpu.memory_space<semaphore_mem>>) src(%arg1 : memref<1024x256xf32, #tpu.memory_space<any>>) dst(%12 : memref<1024x256xf32, #tpu.memory_space<any>>)
    %c2_i32_10 = arith.constant 2 : i32
    %c0_i32_11 = arith.constant 0 : i32
    %c384_i32_12 = arith.constant 384 : i32
    %15 = tpu.memref_slice %arg3[%c0_i32_11, %c384_i32_12] : memref<1024x512xf32, #tpu.memory_space<any>> -> memref<1024x128xf32, #tpu.memory_space<any>>
    %16 = tpu.memref_slice %arg4[%c2_i32_10] : memref<3x!tpu.dma_semaphore, #tpu.memory_space<semaphore_mem>> -> memref<1x!tpu.dma_semaphore, #tpu.memory_space<semaphore_mem>>
    %17 = tpu.memref_squeeze %16 : memref<1x!tpu.dma_semaphore, #tpu.memory_space<semaphore_mem>> -> memref<!tpu.dma_semaphore, #tpu.memory_space<semaphore_mem>>
    tpu.wait_dma2 semaphore(%17 : memref<!tpu.dma_semaphore, #tpu.memory_space<semaphore_mem>>) src(%arg2 : memref<1024x128xf32, #tpu.memory_space<any>>) dst(%15 : memref<1024x128xf32, #tpu.memory_space<any>>)
    return
  }
}

module attributes {stable_mosaic.version = 11 : i64} {
  func.func @_concat_rows_kernel(%arg0: i32, %arg1: memref<512x128xf32, #tpu.memory_space<vmem>>, %arg2: memref<512x256xf32, #tpu.memory_space<vmem>>, %arg3: memref<512x128xf32, #tpu.memory_space<vmem>>, %arg4: memref<512x512xf32, #tpu.memory_space<vmem>>) attributes {dimension_semantics = [#tpu.dimension_semantics<parallel>], iteration_bounds = array<i64: 2>, scalar_prefetch = 0 : i64, scratch_operands = 0 : i64, tpu.core_type = #tpu.core_type<tc>, window_params = [{transform_indices = @transform_0, window_bounds = array<i64: 512, 128>}, {transform_indices = @transform_1, window_bounds = array<i64: 512, 256>}, {transform_indices = @transform_2, window_bounds = array<i64: 512, 128>}, {transform_indices = @transform_3, window_bounds = array<i64: 512, 512>}]} {
    %c0 = arith.constant 0 : index
    %c0_0 = arith.constant 0 : index
    %0 = vector.load %arg1[%c0, %c0_0] : memref<512x128xf32, #tpu.memory_space<vmem>>, vector<512x128xf32>
    %c0_1 = arith.constant 0 : index
    %c0_2 = arith.constant 0 : index
    %1 = vector.load %arg4[%c0_1, %c0_2] : memref<512x512xf32, #tpu.memory_space<vmem>>, vector<512x128xf32>
    tpu.vector_store %arg4[%c0_1, %c0_2], %0 {strides = array<i32>} : memref<512x512xf32, #tpu.memory_space<vmem>>, vector<512x128xf32>,
    %c0_3 = arith.constant 0 : index
    %c0_4 = arith.constant 0 : index
    %2 = vector.load %arg2[%c0_3, %c0_4] : memref<512x256xf32, #tpu.memory_space<vmem>>, vector<512x256xf32>
    %c0_5 = arith.constant 0 : index
    %c128 = arith.constant 128 : index
    %3 = vector.load %arg4[%c0_5, %c128] : memref<512x512xf32, #tpu.memory_space<vmem>>, vector<512x256xf32>
    tpu.vector_store %arg4[%c0_5, %c128], %2 {strides = array<i32>} : memref<512x512xf32, #tpu.memory_space<vmem>>, vector<512x256xf32>,
    %c0_6 = arith.constant 0 : index
    %c0_7 = arith.constant 0 : index
    %4 = vector.load %arg3[%c0_6, %c0_7] : memref<512x128xf32, #tpu.memory_space<vmem>>, vector<512x128xf32>
    %c0_8 = arith.constant 0 : index
    %c384 = arith.constant 384 : index
    %5 = vector.load %arg4[%c0_8, %c384] : memref<512x512xf32, #tpu.memory_space<vmem>>, vector<512x128xf32>
    tpu.vector_store %arg4[%c0_8, %c384], %4 {strides = array<i32>} : memref<512x512xf32, #tpu.memory_space<vmem>>, vector<512x128xf32>,
    return
  }
  func.func @transform_0(%arg0: i32) -> (i32, i32) {
    %c0_i32 = arith.constant 0 : i32
    %c0_i32_0 = arith.constant 0 : i32
    return %arg0, %c0_i32 : i32, i32
  }
  func.func @transform_1(%arg0: i32) -> (i32, i32) {
    %c0_i32 = arith.constant 0 : i32
    %c0_i32_0 = arith.constant 0 : i32
    return %arg0, %c0_i32 : i32, i32
  }
  func.func @transform_2(%arg0: i32) -> (i32, i32) {
    %c0_i32 = arith.constant 0 : i32
    %c0_i32_0 = arith.constant 0 : i32
    return %arg0, %c0_i32 : i32, i32
  }
  func.func @transform_3(%arg0: i32) -> (i32, i32) {
    %c0_i32 = arith.constant 0 : i32
    %c0_i32_0 = arith.constant 0 : i32
    return %arg0, %c0_i32 : i32, i32
  }
}

</mosaic_0001>

<bundles_post_ra>
// kernel: tpu_custom_call.1
= control target key start
LH: loop header
LB: loop body
LE: loop exit
PB: predicated region body
PF: predicated region fallthrough
CT: control target
= control target key end

     0   :  { %s116_s18 = smov 128   ;;  %s117_s19 = smov 512   ;;  %s166_s0 = inlined_call_operand.hbm [shape: f32[1024,128], index: 0, kind: input, shape index: {}]   ;;  %s167_s1 = inlined_call_operand.hbm [shape: f32[1024,256], index: 1, kind: input, shape index: {}]   ;;  %s168_s2 = inlined_call_operand.hbm [shape: f32[1024,128], index: 2, kind: input, shape index: {}]   ;;  %s169_s3 = inlined_call_operand.hbm [shape: f32[1024,512], index: 3, kind: output, shape index: {}]  }
   0x1   :  { %s12_s14 = sshll.u32 %s166_s0, 4  ;;  %s14_s17 = sshll.u32 %s169_s3, 4  ;;  %s13_s14 = int_to_ptr.hbm [resolvable:$true] %s12_s14  ;;  %s15_s17 = int_to_ptr.hbm [resolvable:$true] %s14_s17 }
   0x2   :  { %19 = sst [smem:[#allocation4]] %s116_s18  ;;  %s118_s20 = smov 8  }
   0x3   :  { %21 = sst [smem:[#allocation4 + $0x1]] %s117_s19  ;;  %s119_s21 = smov [#allocation2]  }
   0x4   :  { %23 = sst [smem:[#allocation4 + $0x2]] %s118_s20  ;;  %s120_s22 = smov [#allocation3]  }
   0x5   :  { %s121_s23 = smov 0   ;;  %s122_s24 = smov 256  }
   0x6   :  { %25 = dma.general %s13_s14, 16384, %s15_s17, %s119_s21, %s120_s22, [#allocation4], %s121_s23, 0  }
   0x7   :  { %39 = sst [smem:[#allocation6]] %s122_s24  ;;  %s26_s26 = scalar_lea.hbm %s169_s3, 8 }
   0x8   :  { %41 = sst [smem:[#allocation6 + $0x1]] %s117_s19  ;;  %s123_s27 = smov 16  }
   0x9   :  { %43 = sst [smem:[#allocation6 + $0x2]] %s123_s27  ;;  %s32_s30 = sshll.u32 %s167_s1, 4  ;;  %s33_s30 = int_to_ptr.hbm [resolvable:$true] %s32_s30 }
   0xa   :  { %s34_s4 = sshll.u32 %s26_s26, 4  ;;  %s46_s7 = scalar_lea.hbm %s169_s3, 24  ;;  %s35_s4 = int_to_ptr.hbm [resolvable:$true] %s34_s4 }
   0xb   :  { %s124_s8 = smov [#allocation2 + $0x1]   ;;  %s125_s9 = smov [#allocation5]  }
   0xc   :  { %45 = dma.general %s33_s30, 32768, %s35_s4, %s124_s8, %s125_s9, [#allocation6], %s121_s23, 0  }
   0xd   :  { %59 = sst [smem:[#allocation8]] %s116_s18  ;;  %s52_s12 = sshll.u32 %s168_s2, 4  ;;  %s53_s12 = int_to_ptr.hbm [resolvable:$true] %s52_s12 }
   0xe   :  { %61 = sst [smem:[#allocation8 + $0x1]] %s117_s19  ;;  %s54_s13 = sshll.u32 %s46_s7, 4  ;;  %s55_s13 = int_to_ptr.hbm [resolvable:$true] %s54_s13 }
   0xf   :  { %63 = sst [smem:[#allocation8 + $0x2]] %s118_s20  ;;  %s126_s1 = smov [#allocation2 + $0x2]  }
  0x10   :  { %s127_s14 = smov [#allocation7]  }
  0x11   :  { %65 = dma.general %s53_s12, 16384, %s55_s13, %s126_s1, %s127_s14, [#allocation8], %s121_s23, 0  }
  0x12   :  { %110 = dma.done.wait [#allocation2], 16384 }
  0x13   :  { %111 = vsyncadd [#allocation2], 4294950912 }
  0x14   :  { %112 = dma.done.wait [#allocation2 + $0x1], 32768 }
  0x15   :  { %113 = vsyncadd [#allocation2 + $0x1], 4294934528 }
  0x16   :  { %114 = dma.done.wait [#allocation2 + $0x2], 16384 }
  0x17   :  { %115 = vsyncadd [#allocation2 + $0x2], 4294950912 }
  0x18   :  { %75 = vsyncmov [#allocation2] }
  0x1b   :  { %s76_s3 = vpop.sfrf %75 }
  0x1c   :  { %p95_p0 = scmp.ne.s32.totalorder %s76_s3, 0 }
  0x1e   :  { %80 = shalt.err (%p95_p0)  }
  0x1f   :  { %82 = vsyncmov [#allocation2 + $0x1] }
  0x22   :  { %s83_s2 = vpop.sfrf %82 }
  0x23   :  { %p96_p1 = scmp.ne.s32.totalorder %s83_s2, 0 }
  0x25   :  { %87 = shalt.err (%p96_p1)  }
  0x26   :  { %89 = vsyncmov [#allocation2 + $0x2] }
  0x29   :  { %s90_s15 = vpop.sfrf %89 }
  0x2a   :  { %p97_p2 = scmp.ne.s32.totalorder %s90_s15, 0 }
  0x2c   :  { %94 = shalt.err (%p97_p2)  }

// kernel: tpu_custom_call.1
= control target key start
LH: loop header
LB: loop body
LE: loop exit
PB: predicated region body
PF: predicated region fallthrough
CT: control target
= control target key end

     0   :  { %s1905_s0 = inlined_call_operand.hbm [shape: f32[1024,128], index: 0, kind: input, shape index: {}]   ;;  %s1906_s1 = inlined_call_operand.hbm [shape: f32[1024,256], index: 1, kind: input, shape index: {}]   ;;  %s1907_s2 = inlined_call_operand.hbm [shape: f32[1024,128], index: 2, kind: input, shape index: {}]   ;;  %s1908_s3 = inlined_call_operand.hbm [shape: f32[1024,512], index: 3, kind: output, shape index: {}]  }
   0x1   :  { %1913 = sst [smem:[#allocation15_spill]] %s1906_s1 }
   0x2   :  { %8 = vsyncpa [#allocation3], 0 }
   0x3   :  { %10 = vsyncpa [#allocation3 + $0x1], 0 }
   0x4   :  { %11 = vsyncpa [#allocation6], 0 }
   0x5   :  { %13 = vsyncpa [#allocation6 + $0x1], 0 }
   0x6   :  { %14 = vsyncpa [#allocation4], 0 }
   0x7   :  { %16 = vsyncpa [#allocation4 + $0x1], 0  ;;  %s1202_s12 = smov 0   ;;  %s1204_s13 = smov 0  }
   0x8   :  { %s1206_s14 = smov 0   ;;  %s1208_s15 = smov 0  }
   0x9 LB: > { %1914 = sst [smem:[#allocation12_spill]] %s1170_s14  ;;  %s1223_s16 = sadd.s32 4294967295, %s1174_s15   ;;  %s1174_s15 = sphi %s1208_s15, %s1924_s15   ;;  %s1170_s14 = sphi %s1206_s14, %s1926_s14   ;;  %s1166_s13 = sphi %s1204_s13, %s1928_s13   ;;  %s1162_s12 = sphi %s1202_s12, %s1927_s12  }
   0xa   : > { %s922_s17 = sadd.s32 4294967294, %s1174_s15   ;;  %s1227_s18 = sadd.s32 1, %s1174_s15  }
   0xb   : > { %1915 = sst [smem:[#allocation13_spill]] %s1227_s18  ;;  %s29_s19 = sadd.s32 1, %s1170_s14 }
   0xc   : > { %s26_s20 = ssub.s32 %s1174_s15, %s1227_s18  ;;  %p36_p0 = scmp.ne.s32.totalorder %s1170_s14, %s1166_s13 }
   0xd   : > { %p27_p1 = scmp.eq.s32.totalorder %s26_s20, 0  ;;  %p37_p2 = scmp.eq.s32.totalorder %s1174_s15, 0 }
   0xe   : > { %p42_p3 = scmp.ne.s32.totalorder %s1166_s13, %s1162_s12  ;;  %p43_p4 = scmp.eq.s32.totalorder %s1223_s16, 0 }
   0xf   : > { %s1239_s21 = scalar_select %p27_p1, %s1170_s14, %s29_s19  }
  0x10   : > { %p38_p5 = por %p37_p2, %p36_p0  ;;  %p1241_p6 = por %p43_p4, %p42_p3 }
  0x11   : > { %1916 = sst [smem:[#allocation14_spill]] %s1239_s21  ;;  %p118_p7 = scmp.eq.s32.totalorder %s1223_s16, 1 }
  0x12   : > { %p124_p8 = scmp.eq.s32.totalorder %s922_s17, 1  ;;  %p924_p9 = scmp.ge.s32.totalorder %s1174_s15, 2 }
  0x13   : > { %p974_p10 = scmp.lt.s32.totalorder %s1174_s15, 2  ;;  %p1248_p11 = por %p118_p7, %p36_p0 }
  0x14   : > { %p1252_p12 = por %p124_p8, %p42_p3  ;;  %s1257_s25 = sand.u32 1, %s1170_s14  }
  0x15   : > { %p1259_p13 = pnand %p974_p10, %p38_p5  ;;  %s166_s27 = sand.u32 1, %s1174_s15  }
  0x16   : > { %s928_s28 = sshll.u32 %s1257_s25, 10  ;;  %s948_s29 = sshll.u32 %s1174_s15, 10 }
  0x17   : > { %s1921_s1 = sld [smem:[#allocation15_spill]]  ;;  %s170_s6 = scalar_lea.vmem [#allocation5], %s928_s28 }
  0x18   : > { %s179_s7 = sshll.u32 %s170_s6, 4  ;;  %p935_p0 = scmp.ge.s32.totalorder %s1174_s15, 1  ;;  %s180_s7 = int_to_ptr.vmem [resolvable:$true] %s179_s7 }
  0x19   : > { %s1270_s9 = scalar_lea.sflag [#allocation6], %s166_s27  ;;  %p1018_p2 = pneg %p1259_p13 }
  0x1d   : > { %s176_s5 = scalar_lea.hbm %s1921_s1, %s948_s29  ;;  %s1021_s20 = scalar_lea.hbm %s1921_s1, 2048 }
  0x1e   : > { %s177_s8 = sshll.u32 %s176_s5, 4  ;;  %s178_s8 = int_to_ptr.hbm [resolvable:$true] %s177_s8 }
  0x1f   : > { %s1014_s10 = sshra.s32 %s178_s8, 4  ;;  %s1015_s10 = int_to_ptr.hbm [resolvable:$true] %s1014_s10 }
  0x20   : > { %s1016_s11 = scalar_lea.hbm %s1015_s10, 1024  ;;  %p1022_p5 = scmp.lt.s32.totalorder %s1015_s10, %s1921_s1 }
  0x21   : > { %p1017_p1 = scmp.ne.s32.totalorder %s1015_s10, %s1016_s11  ;;  %p1023_p7 = scmp.lt.s32.totalorder %s1021_s20, %s1016_s11 }
  0x23   : > { %p1019_p3 = pnand %p1018_p2, %p1017_p1  ;;  %p1024_p8 = por %p1023_p7, %p1022_p5 }
  0x25   : > { %p1020_p4 = pneg %p1019_p3 }
  0x27   : > { %p1025_p10 = pnand %p1024_p8, %p1020_p4 }
  0x29   : > { %1028 = shalt.err (!%p1025_p10)
}
  0x2a   : > { %s1176_s27 = smov 256   ;;  %s1177_s30 = smov 16  }
  0x2b   : > { %966 = dma.hbm_to_vmem [thread:$0]  (!%p1259_p13), %s178_s8, 16384, %s180_s7, %s1270_s9, %s1176_s27, %s1176_s27, %s1177_s30  }
  0x2c   : > { %p209_p1 = scmp.lt.s32.totalorder %s1174_s15, 3  ;;  %s1909_s4 = sshll.u32 %s1257_s25, 9 }
  0x2d   : > { %s946_s5 = sshll.u32 %s1174_s15, 9  ;;  %s148_s19 = scalar_lea.vmem [#allocation2], %s1909_s4 }
  0x2e   : > { %p1291_p3 = pnand %p935_p0, %p209_p1  ;;  %s153_s17 = scalar_lea.hbm %s1905_s0, %s946_s5 }
  0x2f   : > { %s156_s20 = sshll.u32 %s148_s19, 4  ;;  %s154_s28 = sshll.u32 %s153_s17, 4  ;;  %s157_s20 = int_to_ptr.vmem [resolvable:$true] %s156_s20  ;;  %s155_s28 = int_to_ptr.hbm [resolvable:$true] %s154_s28 }
  0x30   : > { %s145_s7 = scalar_lea.sflag [#allocation3], %s1257_s25  ;;  %s1044_s8 = sshra.s32 %s155_s28, 4  ;;  %s1045_s8 = int_to_ptr.hbm [resolvable:$true] %s1044_s8 }
  0x31   : > { %s1046_s29 = scalar_lea.hbm %s1045_s8, 512  ;;  %s1051_s10 = scalar_lea.hbm %s1905_s0, 1024 }
  0x32   : > { %p1047_p4 = scmp.ne.s32.totalorder %s1045_s8, %s1046_s29  ;;  %p1052_p7 = scmp.lt.s32.totalorder %s1045_s8, %s1905_s0 }
  0x33   : > { %p1053_p8 = scmp.lt.s32.totalorder %s1051_s10, %s1046_s29 }
  0x34   : > { %p1049_p0 = pnand %p1047_p4, %p1018_p2 }
  0x35   : > { %p1054_p10 = por %p1053_p8, %p1052_p7 }
  0x36   : > { %p1050_p5 = pneg %p1049_p0 }
  0x38   : > { %p1055_p1 = pnand %p1054_p10, %p1050_p5 }
  0x3a   : > { %1058 = shalt.err (!%p1055_p1)
}
  0x3b   : > { %s1178_s17 = smov 128   ;;  %s1179_s19 = smov 8  }
  0x3c   : > { %963 = dma.hbm_to_vmem [thread:$0]  (!%p1259_p13), %s155_s28, 8192, %s157_s20, %s145_s7, %s1178_s17, %s1178_s17, %s1179_s19  }
  0x3d   : > { %s198_s27 = scalar_lea.hbm %s1907_s2, %s946_s5  ;;  %s1923_s30 = sshll.u32 %s1257_s25, 9 }
  0x3e   : > { %s193_s14 = scalar_lea.vmem [#allocation7], %s1923_s30  ;;  %s199_s1 = sshll.u32 %s198_s27, 4  ;;  %s200_s1 = int_to_ptr.hbm [resolvable:$true] %s199_s1 }
  0x3f   : > { %s201_s18 = sshll.u32 %s193_s14, 4  ;;  %s1074_s8 = sshra.s32 %s200_s1, 4  ;;  %s202_s18 = int_to_ptr.vmem [resolvable:$true] %s201_s18  ;;  %s1075_s8 = int_to_ptr.hbm [resolvable:$true] %s1074_s8 }
  0x40   : > { %s1076_s29 = scalar_lea.hbm %s1075_s8, 512  ;;  %s1081_s28 = scalar_lea.hbm %s1907_s2, 1024 }
  0x41   : > { %p1077_p4 = scmp.ne.s32.totalorder %s1075_s8, %s1076_s29  ;;  %p1082_p7 = scmp.lt.s32.totalorder %s1075_s8, %s1907_s2 }
  0x42   : > { %p1083_p8 = scmp.lt.s32.totalorder %s1081_s28, %s1076_s29 }
  0x43   : > { %p1079_p0 = pnand %p1077_p4, %p1018_p2 }
  0x44   : > { %p1084_p10 = por %p1083_p8, %p1082_p7 }
  0x45   : > { %p1080_p5 = pneg %p1079_p0 }
  0x47   : > { %p1085_p1 = pnand %p1084_p10, %p1080_p5 }
  0x49   : > { %1088 = shalt.err (!%p1085_p1)
}
  0x4a   : > { %969 = dma.hbm_to_vmem [thread:$0]  (!%p1259_p13), %s200_s1, 8192, %s202_s18, %s1270_s9, %s1178_s17, %s1178_s17, %s1179_s19  }
  0x4b   : > { %213 = sbr.rel (%p1291_p3) target bundleno = 345 (0x159), region = 32  ;;  %s1332_s14 = sand.u32 (!%p1291_p3), 1, %s1166_s13  }
  0x4c   : > { %s936_s25 = sshll.u32 (!%p1291_p3), %s1332_s14, 9  ;;  %s216_s5 = scalar_lea.sflag (!%p1291_p3), [#allocation3], %s1332_s14 }
  0x4d   : > { %s1338_s7 = scalar_lea.vmem (!%p1291_p3), [#allocation2], %s936_s25 }
  0x50   : > { %1149 = dma.done.wait (%p1241_p6), %s216_s5, 8192  }
  0x51   : > { %1151 = vsyncadd (%p1241_p6), %s216_s5, 4294959104  ;;  %s225_s18 = sand.u32 1, %s1223_s16   ;;  %s937_s26 = sshll.u32 %s1332_s14, 10 }
  0x52   : > { %s226_s9 = scalar_lea.sflag [#allocation6], %s225_s18  ;;  %s1346_s6 = scalar_lea.vmem [#allocation5], %s937_s26 }
  0x53   : > { %1153 = dma.done.wait (%p1241_p6), %s226_s9, 24576  }
  0x54   : > { %1155 = vsyncadd (%p1241_p6), %s226_s9, 4294942720  ;;  %s939_s11 = sshll.u32 %s1332_s14, 11  ;;  %v277_v0 = vld [vmem:[%s1338_s7] sm:$0xff]  ;;  %v278_v1 = vld [vmem:[%s1338_s7 + $0x8] sm:$0xff]  ;;  %s1739_s22 = scalar_lea.vmem [#allocation7], %s936_s25 }
  0x55   : > { %v279_v2 = vld [vmem:[%s1338_s7 + $0x10] sm:$0xff]  ;;  %s1356_s17 = scalar_lea.vmem [#allocation8], %s939_s11  ;;  %v280_v3 = vld [vmem:[%s1338_s7 + $0x18] sm:$0xff]  ;;  %v281_v4 = vld [vmem:[%s1338_s7 + $0x20] sm:$0xff]  ;;  %s951_s19 = sshll.u32 %s1223_s16, 11 }
  0x56   : > { %341 = vst [vmem:[%s1356_s17] sm:$0xff] %v277_v0  ;;  %v282_v5 = vld [vmem:[%s1338_s7 + $0x28] sm:$0xff]  ;;  %v283_v6 = vld [vmem:[%s1338_s7 + $0x30] sm:$0xff]  ;;  %v284_v7 = vld [vmem:[%s1338_s7 + $0x38] sm:$0xff]  ;;  %s802_s1 = scalar_lea.hbm %s1908_s3, %s951_s19  ;;  %s803_s16 = sshll.u32 %s1356_s17, 4  ;;  %s804_s16 = int_to_ptr.vmem [resolvable:$true] %s803_s16 }
  0x57   : > { %342 = vst [vmem:[%s1356_s17 + $0x20] sm:$0xff] %v278_v1  ;;  %v285_v8 = vld [vmem:[%s1338_s7 + $0x40] sm:$0xff]  ;;  %v286_v9 = vld [vmem:[%s1338_s7 + $0x48] sm:$0xff]  ;;  %v287_v10 = vld [vmem:[%s1338_s7 + $0x50] sm:$0xff]  ;;  %s805_s8 = sshll.u32 %s802_s1, 4  ;;  %s790_s29 = scalar_lea.sflag [#allocation4], %s1332_s14  ;;  %s806_s8 = int_to_ptr.hbm [resolvable:$true] %s805_s8 }
  0x58   : > { %343 = vst [vmem:[%s1356_s17 + $0x40] sm:$0xff] %v279_v2  ;;  %v288_v11 = vld [vmem:[%s1338_s7 + $0x58] sm:$0xff]  ;;  %v289_v12 = vld [vmem:[%s1338_s7 + $0x60] sm:$0xff]  ;;  %v290_v13 = vld [vmem:[%s1338_s7 + $0x68] sm:$0xff]  ;;  %s1118_s10 = sshra.s32 %s806_s8, 4  ;;  %s1124_s4 = scalar_lea.hbm %s1908_s3, 4096  ;;  %s1119_s10 = int_to_ptr.hbm [resolvable:$true] %s1118_s10 }
  0x59   : > { %344 = vst [vmem:[%s1356_s17 + $0x60] sm:$0xff] %v280_v3  ;;  %v291_v14 = vld [vmem:[%s1338_s7 + $0x70] sm:$0xff]  ;;  %v292_v15 = vld [vmem:[%s1338_s7 + $0x78] sm:$0xff]  ;;  %v293_v16 = vld [vmem:[%s1338_s7 + $0x80] sm:$0xff]  ;;  %s1120_s20 = scalar_lea.hbm %s1119_s10, 2048  ;;  %p1125_p3 = scmp.lt.s32.totalorder %s1119_s10, %s1908_s3 }
  0x5a   : > { %345 = vst [vmem:[%s1356_s17 + $0x80] sm:$0xff] %v281_v4  ;;  %v294_v17 = vld [vmem:[%s1338_s7 + $0x88] sm:$0xff]  ;;  %v295_v18 = vld [vmem:[%s1338_s7 + $0x90] sm:$0xff]  ;;  %v296_v19 = vld [vmem:[%s1338_s7 + $0x98] sm:$0xff]  ;;  %p1121_p6 = scmp.ne.s32.totalorder %s1119_s10, %s1120_s20  ;;  %p1126_p4 = scmp.lt.s32.totalorder %s1124_s4, %s1120_s20 }
  0x5b   : > { %346 = vst [vmem:[%s1356_s17 + $0xa0] sm:$0xff] %v282_v5  ;;  %v297_v20 = vld [vmem:[%s1338_s7 + $0xa0] sm:$0xff]  ;;  %v298_v21 = vld [vmem:[%s1338_s7 + $0xa8] sm:$0xff]  ;;  %v299_v22 = vld [vmem:[%s1338_s7 + $0xb0] sm:$0xff] }
  0x5c   : > { %347 = vst [vmem:[%s1356_s17 + $0xc0] sm:$0xff] %v283_v6  ;;  %v300_v23 = vld [vmem:[%s1338_s7 + $0xb8] sm:$0xff]  ;;  %v301_v24 = vld [vmem:[%s1338_s7 + $0xc0] sm:$0xff]  ;;  %v302_v25 = vld [vmem:[%s1338_s7 + $0xc8] sm:$0xff]  ;;  %p1122_p13 = pnand %p1121_p6, %p1248_p11  ;;  %p1127_p0 = por %p1126_p4, %p1125_p3 }
  0x5d   : > { %348 = vst [vmem:[%s1356_s17 + $0xe0] sm:$0xff] %v284_v7  ;;  %v303_v26 = vld [vmem:[%s1338_s7 + $0xd0] sm:$0xff]  ;;  %v304_v27 = vld [vmem:[%s1338_s7 + $0xd8] sm:$0xff]  ;;  %v305_v28 = vld [vmem:[%s1338_s7 + $0xe0] sm:$0xff] }
  0x5e   : > { %349 = vst [vmem:[%s1356_s17 + $0x100] sm:$0xff] %v285_v8  ;;  %v306_v29 = vld [vmem:[%s1338_s7 + $0xe8] sm:$0xff]  ;;  %v307_v30 = vld [vmem:[%s1338_s7 + $0xf0] sm:$0xff]  ;;  %v308_v31 = vld [vmem:[%s1338_s7 + $0xf8] sm:$0xff]  ;;  %p1123_p2 = pneg %p1122_p13 }
  0x5f   : > { %350 = vst [vmem:[%s1356_s17 + $0x120] sm:$0xff] %v286_v9  ;;  %v309_v32 = vld [vmem:[%s1338_s7 + $0x100] sm:$0xff]  ;;  %v310_v33 = vld [vmem:[%s1338_s7 + $0x108] sm:$0xff]  ;;  %v311_v34 = vld [vmem:[%s1338_s7 + $0x110] sm:$0xff] }
  0x60   : > { %351 = vst [vmem:[%s1356_s17 + $0x140] sm:$0xff] %v287_v10  ;;  %v312_v35 = vld [vmem:[%s1338_s7 + $0x118] sm:$0xff]  ;;  %v313_v36 = vld [vmem:[%s1338_s7 + $0x120] sm:$0xff]  ;;  %v314_v37 = vld [vmem:[%s1338_s7 + $0x128] sm:$0xff]  ;;  %p1128_p5 = pnand %p1127_p0, %p1123_p2 }
  0x61   : > { %352 = vst [vmem:[%s1356_s17 + $0x160] sm:$0xff] %v288_v11  ;;  %v315_v38 = vld [vmem:[%s1338_s7 + $0x130] sm:$0xff]  ;;  %v316_v39 = vld [vmem:[%s1338_s7 + $0x138] sm:$0xff]  ;;  %v317_v40 = vld [vmem:[%s1338_s7 + $0x140] sm:$0xff] }
  0x62   : > { %353 = vst [vmem:[%s1356_s17 + $0x180] sm:$0xff] %v289_v12  ;;  %v318_v41 = vld [vmem:[%s1338_s7 + $0x148] sm:$0xff]  ;;  %v319_v42 = vld [vmem:[%s1338_s7 + $0x150] sm:$0xff]  ;;  %v320_v43 = vld [vmem:[%s1338_s7 + $0x158] sm:$0xff] }
  0x63   : > { %354 = vst [vmem:[%s1356_s17 + $0x1a0] sm:$0xff] %v290_v13  ;;  %v321_v44 = vld [vmem:[%s1338_s7 + $0x160] sm:$0xff]  ;;  %v322_v45 = vld [vmem:[%s1338_s7 + $0x168] sm:$0xff]  ;;  %v323_v46 = vld [vmem:[%s1338_s7 + $0x170] sm:$0xff] }
  0x64   : > { %355 = vst [vmem:[%s1356_s17 + $0x1c0] sm:$0xff] %v291_v14  ;;  %v324_v47 = vld [vmem:[%s1338_s7 + $0x178] sm:$0xff]  ;;  %v325_v48 = vld [vmem:[%s1338_s7 + $0x180] sm:$0xff]  ;;  %v326_v49 = vld [vmem:[%s1338_s7 + $0x188] sm:$0xff] }
  0x65   : > { %356 = vst [vmem:[%s1356_s17 + $0x1e0] sm:$0xff] %v292_v15  ;;  %v327_v50 = vld [vmem:[%s1338_s7 + $0x190] sm:$0xff]  ;;  %v328_v51 = vld [vmem:[%s1338_s7 + $0x198] sm:$0xff]  ;;  %v329_v52 = vld [vmem:[%s1338_s7 + $0x1a0] sm:$0xff] }
  0x66   : > { %357 = vst [vmem:[%s1356_s17 + $0x200] sm:$0xff] %v293_v16  ;;  %v330_v53 = vld [vmem:[%s1338_s7 + $0x1a8] sm:$0xff]  ;;  %v331_v54 = vld [vmem:[%s1338_s7 + $0x1b0] sm:$0xff]  ;;  %v332_v55 = vld [vmem:[%s1338_s7 + $0x1b8] sm:$0xff] }
  0x67   : > { %358 = vst [vmem:[%s1356_s17 + $0x220] sm:$0xff] %v294_v17  ;;  %v333_v56 = vld [vmem:[%s1338_s7 + $0x1c0] sm:$0xff]  ;;  %v334_v57 = vld [vmem:[%s1338_s7 + $0x1c8] sm:$0xff]  ;;  %v335_v58 = vld [vmem:[%s1338_s7 + $0x1d0] sm:$0xff] }
  0x68   : > { %359 = vst [vmem:[%s1356_s17 + $0x240] sm:$0xff] %v295_v18  ;;  %v336_v59 = vld [vmem:[%s1338_s7 + $0x1d8] sm:$0xff]  ;;  %v337_v60 = vld [vmem:[%s1338_s7 + $0x1e0] sm:$0xff]  ;;  %v338_v61 = vld [vmem:[%s1338_s7 + $0x1e8] sm:$0xff] }
  0x69   : > { %360 = vst [vmem:[%s1356_s17 + $0x260] sm:$0xff] %v296_v19  ;;  %v339_v62 = vld [vmem:[%s1338_s7 + $0x1f0] sm:$0xff]  ;;  %v340_v63 = vld [vmem:[%s1338_s7 + $0x1f8] sm:$0xff]  ;;  %v405_v0 = vld [vmem:[%s1346_s6] sm:$0xff] }
  0x6a   : > { %361 = vst [vmem:[%s1356_s17 + $0x280] sm:$0xff] %v297_v20  ;;  %v406_v1 = vld [vmem:[%s1346_s6 + $0x8] sm:$0xff]  ;;  %v407_v2 = vld [vmem:[%s1346_s6 + $0x10] sm:$0xff]  ;;  %v408_v3 = vld [vmem:[%s1346_s6 + $0x18] sm:$0xff] }
  0x6b   : > { %362 = vst [vmem:[%s1356_s17 + $0x2a0] sm:$0xff] %v298_v21  ;;  %v409_v4 = vld [vmem:[%s1346_s6 + $0x20] sm:$0xff]  ;;  %v410_v5 = vld [vmem:[%s1346_s6 + $0x28] sm:$0xff]  ;;  %v411_v6 = vld [vmem:[%s1346_s6 + $0x30] sm:$0xff] }
  0x6c   : > { %363 = vst [vmem:[%s1356_s17 + $0x2c0] sm:$0xff] %v299_v22  ;;  %v412_v7 = vld [vmem:[%s1346_s6 + $0x38] sm:$0xff]  ;;  %v413_v8 = vld [vmem:[%s1346_s6 + $0x40] sm:$0xff]  ;;  %v414_v9 = vld [vmem:[%s1346_s6 + $0x48] sm:$0xff] }
  0x6d   : > { %364 = vst [vmem:[%s1356_s17 + $0x2e0] sm:$0xff] %v300_v23  ;;  %v415_v10 = vld [vmem:[%s1346_s6 + $0x50] sm:$0xff]  ;;  %v416_v11 = vld [vmem:[%s1346_s6 + $0x58] sm:$0xff]  ;;  %v417_v12 = vld [vmem:[%s1346_s6 + $0x60] sm:$0xff] }
  0x6e   : > { %365 = vst [vmem:[%s1356_s17 + $0x300] sm:$0xff] %v301_v24  ;;  %v418_v13 = vld [vmem:[%s1346_s6 + $0x68] sm:$0xff]  ;;  %v419_v14 = vld [vmem:[%s1346_s6 + $0x70] sm:$0xff]  ;;  %v420_v15 = vld [vmem:[%s1346_s6 + $0x78] sm:$0xff] }
  0x6f   : > { %366 = vst [vmem:[%s1356_s17 + $0x320] sm:$0xff] %v302_v25  ;;  %v421_v16 = vld [vmem:[%s1346_s6 + $0x80] sm:$0xff]  ;;  %v422_v17 = vld [vmem:[%s1346_s6 + $0x88] sm:$0xff]  ;;  %v423_v18 = vld [vmem:[%s1346_s6 + $0x90] sm:$0xff] }
  0x70   : > { %367 = vst [vmem:[%s1356_s17 + $0x340] sm:$0xff] %v303_v26  ;;  %v424_v19 = vld [vmem:[%s1346_s6 + $0x98] sm:$0xff]  ;;  %v425_v20 = vld [vmem:[%s1346_s6 + $0xa0] sm:$0xff]  ;;  %v426_v21 = vld [vmem:[%s1346_s6 + $0xa8] sm:$0xff] }
  0x71   : > { %368 = vst [vmem:[%s1356_s17 + $0x360] sm:$0xff] %v304_v27  ;;  %v427_v22 = vld [vmem:[%s1346_s6 + $0xb0] sm:$0xff]  ;;  %v428_v23 = vld [vmem:[%s1346_s6 + $0xb8] sm:$0xff]  ;;  %v429_v24 = vld [vmem:[%s1346_s6 + $0xc0] sm:$0xff] }
  0x72   : > { %369 = vst [vmem:[%s1356_s17 + $0x380] sm:$0xff] %v305_v28  ;;  %v430_v25 = vld [vmem:[%s1346_s6 + $0xc8] sm:$0xff]  ;;  %v431_v26 = vld [vmem:[%s1346_s6 + $0xd0] sm:$0xff]  ;;  %v432_v27 = vld [vmem:[%s1346_s6 + $0xd8] sm:$0xff] }
  0x73   : > { %370 = vst [vmem:[%s1356_s17 + $0x3a0] sm:$0xff] %v306_v29  ;;  %v433_v28 = vld [vmem:[%s1346_s6 + $0xe0] sm:$0xff]  ;;  %v434_v29 = vld [vmem:[%s1346_s6 + $0xe8] sm:$0xff] }
  0x74   : > { %371 = vst [vmem:[%s1356_s17 + $0x3c0] sm:$0xff] %v307_v30  ;;  %v435_v30 = vld [vmem:[%s1346_s6 + $0xf0] sm:$0xff] }
  0x75   : > { %372 = vst [vmem:[%s1356_s17 + $0x3e0] sm:$0xff] %v308_v31  ;;  %v436_v31 = vld [vmem:[%s1346_s6 + $0xf8] sm:$0xff] }
  0x76   : > { %373 = vst [vmem:[%s1356_s17 + $0x400] sm:$0xff] %v309_v32  ;;  %v437_v32 = vld [vmem:[%s1346_s6 + $0x100] sm:$0xff] }
  0x77   : > { %374 = vst [vmem:[%s1356_s17 + $0x420] sm:$0xff] %v310_v33  ;;  %v438_v33 = vld [vmem:[%s1346_s6 + $0x108] sm:$0xff] }
  0x78   : > { %375 = vst [vmem:[%s1356_s17 + $0x440] sm:$0xff] %v311_v34  ;;  %v439_v34 = vld [vmem:[%s1346_s6 + $0x110] sm:$0xff] }
  0x79   : > { %376 = vst [vmem:[%s1356_s17 + $0x460] sm:$0xff] %v312_v35  ;;  %v440_v35 = vld [vmem:[%s1346_s6 + $0x118] sm:$0xff] }
  0x7a   : > { %377 = vst [vmem:[%s1356_s17 + $0x480] sm:$0xff] %v313_v36  ;;  %v441_v36 = vld [vmem:[%s1346_s6 + $0x120] sm:$0xff] }
  0x7b   : > { %378 = vst [vmem:[%s1356_s17 + $0x4a0] sm:$0xff] %v314_v37  ;;  %v442_v37 = vld [vmem:[%s1346_s6 + $0x128] sm:$0xff] }
  0x7c   : > { %379 = vst [vmem:[%s1356_s17 + $0x4c0] sm:$0xff] %v315_v38  ;;  %v443_v38 = vld [vmem:[%s1346_s6 + $0x130] sm:$0xff] }
  0x7d   : > { %380 = vst [vmem:[%s1356_s17 + $0x4e0] sm:$0xff] %v316_v39  ;;  %v444_v39 = vld [vmem:[%s1346_s6 + $0x138] sm:$0xff] }
  0x7e   : > { %381 = vst [vmem:[%s1356_s17 + $0x500] sm:$0xff] %v317_v40  ;;  %v445_v40 = vld [vmem:[%s1346_s6 + $0x140] sm:$0xff] }
  0x7f   : > { %382 = vst [vmem:[%s1356_s17 + $0x520] sm:$0xff] %v318_v41  ;;  %v446_v41 = vld [vmem:[%s1346_s6 + $0x148] sm:$0xff] }
  0x80   : > { %383 = vst [vmem:[%s1356_s17 + $0x540] sm:$0xff] %v319_v42  ;;  %v447_v42 = vld [vmem:[%s1346_s6 + $0x150] sm:$0xff] }
  0x81   : > { %384 = vst [vmem:[%s1356_s17 + $0x560] sm:$0xff] %v320_v43  ;;  %v448_v43 = vld [vmem:[%s1346_s6 + $0x158] sm:$0xff] }
  0x82   : > { %385 = vst [vmem:[%s1356_s17 + $0x580] sm:$0xff] %v321_v44  ;;  %v449_v44 = vld [vmem:[%s1346_s6 + $0x160] sm:$0xff] }
  0x83   : > { %386 = vst [vmem:[%s1356_s17 + $0x5a0] sm:$0xff] %v322_v45  ;;  %v450_v45 = vld [vmem:[%s1346_s6 + $0x168] sm:$0xff] }
  0x84   : > { %387 = vst [vmem:[%s1356_s17 + $0x5c0] sm:$0xff] %v323_v46  ;;  %v451_v46 = vld [vmem:[%s1346_s6 + $0x170] sm:$0xff] }
  0x85   : > { %388 = vst [vmem:[%s1356_s17 + $0x5e0] sm:$0xff] %v324_v47  ;;  %v452_v47 = vld [vmem:[%s1346_s6 + $0x178] sm:$0xff] }
  0x86   : > { %389 = vst [vmem:[%s1356_s17 + $0x600] sm:$0xff] %v325_v48  ;;  %v453_v48 = vld [vmem:[%s1346_s6 + $0x180] sm:$0xff] }
  0x87   : > { %390 = vst [vmem:[%s1356_s17 + $0x620] sm:$0xff] %v326_v49  ;;  %v454_v49 = vld [vmem:[%s1346_s6 + $0x188] sm:$0xff] }
  0x88   : > { %391 = vst [vmem:[%s1356_s17 + $0x640] sm:$0xff] %v327_v50  ;;  %v455_v50 = vld [vmem:[%s1346_s6 + $0x190] sm:$0xff] }
  0x89   : > { %392 = vst [vmem:[%s1356_s17 + $0x660] sm:$0xff] %v328_v51  ;;  %v456_v51 = vld [vmem:[%s1346_s6 + $0x198] sm:$0xff] }
  0x8a   : > { %393 = vst [vmem:[%s1356_s17 + $0x680] sm:$0xff] %v329_v52  ;;  %v457_v52 = vld [vmem:[%s1346_s6 + $0x1a0] sm:$0xff] }
  0x8b   : > { %394 = vst [vmem:[%s1356_s17 + $0x6a0] sm:$0xff] %v330_v53  ;;  %v458_v53 = vld [vmem:[%s1346_s6 + $0x1a8] sm:$0xff] }
  0x8c   : > { %395 = vst [vmem:[%s1356_s17 + $0x6c0] sm:$0xff] %v331_v54  ;;  %v459_v54 = vld [vmem:[%s1346_s6 + $0x1b0] sm:$0xff] }
  0x8d   : > { %396 = vst [vmem:[%s1356_s17 + $0x6e0] sm:$0xff] %v332_v55  ;;  %v460_v55 = vld [vmem:[%s1346_s6 + $0x1b8] sm:$0xff] }
  0x8e   : > { %397 = vst [vmem:[%s1356_s17 + $0x700] sm:$0xff] %v333_v56  ;;  %v461_v56 = vld [vmem:[%s1346_s6 + $0x1c0] sm:$0xff] }
  0x8f   : > { %398 = vst [vmem:[%s1356_s17 + $0x720] sm:$0xff] %v334_v57  ;;  %v462_v57 = vld [vmem:[%s1346_s6 + $0x1c8] sm:$0xff] }
  0x90   : > { %399 = vst [vmem:[%s1356_s17 + $0x740] sm:$0xff] %v335_v58  ;;  %v463_v58 = vld [vmem:[%s1346_s6 + $0x1d0] sm:$0xff] }
  0x91   : > { %400 = vst [vmem:[%s1356_s17 + $0x760] sm:$0xff] %v336_v59  ;;  %v464_v59 = vld [vmem:[%s1346_s6 + $0x1d8] sm:$0xff] }
  0x92   : > { %401 = vst [vmem:[%s1356_s17 + $0x780] sm:$0xff] %v337_v60  ;;  %v465_v60 = vld [vmem:[%s1346_s6 + $0x1e0] sm:$0xff] }
  0x93   : > { %402 = vst [vmem:[%s1356_s17 + $0x7a0] sm:$0xff] %v338_v61  ;;  %v466_v61 = vld [vmem:[%s1346_s6 + $0x1e8] sm:$0xff] }
  0x94   : > { %403 = vst [vmem:[%s1356_s17 + $0x7c0] sm:$0xff] %v339_v62  ;;  %v467_v62 = vld [vmem:[%s1346_s6 + $0x1f0] sm:$0xff] }
  0x95   : > { %404 = vst [vmem:[%s1356_s17 + $0x7e0] sm:$0xff] %v340_v63  ;;  %v468_v63 = vld [vmem:[%s1346_s6 + $0x1f8] sm:$0xff] }
  0x96   : > { %533 = vst [vmem:[%s1356_s17 + $0x8] sm:$0xff] %v405_v0  ;;  %v469_v0 = vld [vmem:[%s1346_s6 + $0x200] sm:$0xff] }
  0x97   : > { %534 = vst [vmem:[%s1356_s17 + $0x10] sm:$0xff] %v406_v1  ;;  %v470_v1 = vld [vmem:[%s1346_s6 + $0x208] sm:$0xff] }
  0x98   : > { %535 = vst [vmem:[%s1356_s17 + $0x28] sm:$0xff] %v407_v2  ;;  %v471_v2 = vld [vmem:[%s1346_s6 + $0x210] sm:$0xff] }
  0x99   : > { %536 = vst [vmem:[%s1356_s17 + $0x30] sm:$0xff] %v408_v3  ;;  %v472_v3 = vld [vmem:[%s1346_s6 + $0x218] sm:$0xff] }
  0x9a   : > { %537 = vst [vmem:[%s1356_s17 + $0x48] sm:$0xff] %v409_v4  ;;  %v473_v4 = vld [vmem:[%s1346_s6 + $0x220] sm:$0xff] }
  0x9b   : > { %538 = vst [vmem:[%s1356_s17 + $0x50] sm:$0xff] %v410_v5  ;;  %v474_v5 = vld [vmem:[%s1346_s6 + $0x228] sm:$0xff] }
  0x9c   : > { %539 = vst [vmem:[%s1356_s17 + $0x68] sm:$0xff] %v411_v6  ;;  %v475_v6 = vld [vmem:[%s1346_s6 + $0x230] sm:$0xff] }
  0x9d   : > { %540 = vst [vmem:[%s1356_s17 + $0x70] sm:$0xff] %v412_v7  ;;  %v476_v7 = vld [vmem:[%s1346_s6 + $0x238] sm:$0xff] }
  0x9e   : > { %541 = vst [vmem:[%s1356_s17 + $0x88] sm:$0xff] %v413_v8  ;;  %v477_v8 = vld [vmem:[%s1346_s6 + $0x240] sm:$0xff] }
  0x9f   : > { %542 = vst [vmem:[%s1356_s17 + $0x90] sm:$0xff] %v414_v9  ;;  %v478_v9 = vld [vmem:[%s1346_s6 + $0x248] sm:$0xff] }
  0xa0   : > { %543 = vst [vmem:[%s1356_s17 + $0xa8] sm:$0xff] %v415_v10  ;;  %v479_v10 = vld [vmem:[%s1346_s6 + $0x250] sm:$0xff] }
  0xa1   : > { %544 = vst [vmem:[%s1356_s17 + $0xb0] sm:$0xff] %v416_v11  ;;  %v480_v11 = vld [vmem:[%s1346_s6 + $0x258] sm:$0xff] }
  0xa2   : > { %545 = vst [vmem:[%s1356_s17 + $0xc8] sm:$0xff] %v417_v12  ;;  %v481_v12 = vld [vmem:[%s1346_s6 + $0x260] sm:$0xff] }
  0xa3   : > { %546 = vst [vmem:[%s1356_s17 + $0xd0] sm:$0xff] %v418_v13  ;;  %v482_v13 = vld [vmem:[%s1346_s6 + $0x268] sm:$0xff] }
  0xa4   : > { %547 = vst [vmem:[%s1356_s17 + $0xe8] sm:$0xff] %v419_v14  ;;  %v483_v14 = vld [vmem:[%s1346_s6 + $0x270] sm:$0xff] }
  0xa5   : > { %548 = vst [vmem:[%s1356_s17 + $0xf0] sm:$0xff] %v420_v15  ;;  %v484_v15 = vld [vmem:[%s1346_s6 + $0x278] sm:$0xff] }
  0xa6   : > { %549 = vst [vmem:[%s1356_s17 + $0x108] sm:$0xff] %v421_v16  ;;  %v485_v16 = vld [vmem:[%s1346_s6 + $0x280] sm:$0xff] }
  0xa7   : > { %550 = vst [vmem:[%s1356_s17 + $0x110] sm:$0xff] %v422_v17  ;;  %v486_v17 = vld [vmem:[%s1346_s6 + $0x288] sm:$0xff] }
  0xa8   : > { %551 = vst [vmem:[%s1356_s17 + $0x128] sm:$0xff] %v423_v18  ;;  %v487_v18 = vld [vmem:[%s1346_s6 + $0x290] sm:$0xff] }
  0xa9   : > { %552 = vst [vmem:[%s1356_s17 + $0x130] sm:$0xff] %v424_v19  ;;  %v488_v19 = vld [vmem:[%s1346_s6 + $0x298] sm:$0xff] }
  0xaa   : > { %553 = vst [vmem:[%s1356_s17 + $0x148] sm:$0xff] %v425_v20  ;;  %v489_v20 = vld [vmem:[%s1346_s6 + $0x2a0] sm:$0xff] }
  0xab   : > { %554 = vst [vmem:[%s1356_s17 + $0x150] sm:$0xff] %v426_v21  ;;  %v490_v21 = vld [vmem:[%s1346_s6 + $0x2a8] sm:$0xff] }
  0xac   : > { %555 = vst [vmem:[%s1356_s17 + $0x168] sm:$0xff] %v427_v22  ;;  %v491_v22 = vld [vmem:[%s1346_s6 + $0x2b0] sm:$0xff] }
  0xad   : > { %556 = vst [vmem:[%s1356_s17 + $0x170] sm:$0xff] %v428_v23  ;;  %v492_v23 = vld [vmem:[%s1346_s6 + $0x2b8] sm:$0xff] }
  0xae   : > { %557 = vst [vmem:[%s1356_s17 + $0x188] sm:$0xff] %v429_v24  ;;  %v493_v24 = vld [vmem:[%s1346_s6 + $0x2c0] sm:$0xff] }
  0xaf   : > { %558 = vst [vmem:[%s1356_s17 + $0x190] sm:$0xff] %v430_v25  ;;  %v494_v25 = vld [vmem:[%s1346_s6 + $0x2c8] sm:$0xff] }
  0xb0   : > { %559 = vst [vmem:[%s1356_s17 + $0x1a8] sm:$0xff] %v431_v26  ;;  %v495_v26 = vld [vmem:[%s1346_s6 + $0x2d0] sm:$0xff] }
  0xb1   : > { %560 = vst [vmem:[%s1356_s17 + $0x1b0] sm:$0xff] %v432_v27  ;;  %v496_v27 = vld [vmem:[%s1346_s6 + $0x2d8] sm:$0xff] }
  0xb2   : > { %561 = vst [vmem:[%s1356_s17 + $0x1c8] sm:$0xff] %v433_v28  ;;  %v497_v28 = vld [vmem:[%s1346_s6 + $0x2e0] sm:$0xff] }
  0xb3   : > { %562 = vst [vmem:[%s1356_s17 + $0x1d0] sm:$0xff] %v434_v29  ;;  %v498_v29 = vld [vmem:[%s1346_s6 + $0x2e8] sm:$0xff] }
  0xb4   : > { %563 = vst [vmem:[%s1356_s17 + $0x1e8] sm:$0xff] %v435_v30  ;;  %v499_v30 = vld [vmem:[%s1346_s6 + $0x2f0] sm:$0xff] }
  0xb5   : > { %564 = vst [vmem:[%s1356_s17 + $0x1f0] sm:$0xff] %v436_v31  ;;  %v500_v31 = vld [vmem:[%s1346_s6 + $0x2f8] sm:$0xff] }
  0xb6   : > { %565 = vst [vmem:[%s1356_s17 + $0x208] sm:$0xff] %v437_v32  ;;  %v501_v32 = vld [vmem:[%s1346_s6 + $0x300] sm:$0xff] }
  0xb7   : > { %566 = vst [vmem:[%s1356_s17 + $0x210] sm:$0xff] %v438_v33  ;;  %v502_v33 = vld [vmem:[%s1346_s6 + $0x308] sm:$0xff] }
  0xb8   : > { %567 = vst [vmem:[%s1356_s17 + $0x228] sm:$0xff] %v439_v34  ;;  %v503_v34 = vld [vmem:[%s1346_s6 + $0x310] sm:$0xff] }
  0xb9   : > { %568 = vst [vmem:[%s1356_s17 + $0x230] sm:$0xff] %v440_v35  ;;  %v504_v35 = vld [vmem:[%s1346_s6 + $0x318] sm:$0xff] }
  0xba   : > { %569 = vst [vmem:[%s1356_s17 + $0x248] sm:$0xff] %v441_v36  ;;  %v505_v36 = vld [vmem:[%s1346_s6 + $0x320] sm:$0xff] }
  0xbb   : > { %570 = vst [vmem:[%s1356_s17 + $0x250] sm:$0xff] %v442_v37  ;;  %v506_v37 = vld [vmem:[%s1346_s6 + $0x328] sm:$0xff] }
  0xbc   : > { %571 = vst [vmem:[%s1356_s17 + $0x268] sm:$0xff] %v443_v38  ;;  %v507_v38 = vld [vmem:[%s1346_s6 + $0x330] sm:$0xff] }
  0xbd   : > { %572 = vst [vmem:[%s1356_s17 + $0x270] sm:$0xff] %v444_v39  ;;  %v508_v39 = vld [vmem:[%s1346_s6 + $0x338] sm:$0xff] }
  0xbe   : > { %573 = vst [vmem:[%s1356_s17 + $0x288] sm:$0xff] %v445_v40  ;;  %v509_v40 = vld [vmem:[%s1346_s6 + $0x340] sm:$0xff] }
  0xbf   : > { %574 = vst [vmem:[%s1356_s17 + $0x290] sm:$0xff] %v446_v41  ;;  %v510_v41 = vld [vmem:[%s1346_s6 + $0x348] sm:$0xff] }
  0xc0   : > { %575 = vst [vmem:[%s1356_s17 + $0x2a8] sm:$0xff] %v447_v42  ;;  %v511_v42 = vld [vmem:[%s1346_s6 + $0x350] sm:$0xff] }
  0xc1   : > { %576 = vst [vmem:[%s1356_s17 + $0x2b0] sm:$0xff] %v448_v43  ;;  %v512_v43 = vld [vmem:[%s1346_s6 + $0x358] sm:$0xff] }
  0xc2   : > { %577 = vst [vmem:[%s1356_s17 + $0x2c8] sm:$0xff] %v449_v44  ;;  %v513_v44 = vld [vmem:[%s1346_s6 + $0x360] sm:$0xff] }
  0xc3   : > { %578 = vst [vmem:[%s1356_s17 + $0x2d0] sm:$0xff] %v450_v45  ;;  %v514_v45 = vld [vmem:[%s1346_s6 + $0x368] sm:$0xff] }
  0xc4   : > { %579 = vst [vmem:[%s1356_s17 + $0x2e8] sm:$0xff] %v451_v46  ;;  %v515_v46 = vld [vmem:[%s1346_s6 + $0x370] sm:$0xff] }
  0xc5   : > { %580 = vst [vmem:[%s1356_s17 + $0x2f0] sm:$0xff] %v452_v47  ;;  %v516_v47 = vld [vmem:[%s1346_s6 + $0x378] sm:$0xff] }
  0xc6   : > { %581 = vst [vmem:[%s1356_s17 + $0x308] sm:$0xff] %v453_v48  ;;  %v517_v48 = vld [vmem:[%s1346_s6 + $0x380] sm:$0xff] }
  0xc7   : > { %582 = vst [vmem:[%s1356_s17 + $0x310] sm:$0xff] %v454_v49  ;;  %v518_v49 = vld [vmem:[%s1346_s6 + $0x388] sm:$0xff] }
  0xc8   : > { %583 = vst [vmem:[%s1356_s17 + $0x328] sm:$0xff] %v455_v50  ;;  %v519_v50 = vld [vmem:[%s1346_s6 + $0x390] sm:$0xff] }
  0xc9   : > { %584 = vst [vmem:[%s1356_s17 + $0x330] sm:$0xff] %v456_v51  ;;  %v520_v51 = vld [vmem:[%s1346_s6 + $0x398] sm:$0xff] }
  0xca   : > { %585 = vst [vmem:[%s1356_s17 + $0x348] sm:$0xff] %v457_v52  ;;  %v521_v52 = vld [vmem:[%s1346_s6 + $0x3a0] sm:$0xff] }
  0xcb   : > { %586 = vst [vmem:[%s1356_s17 + $0x350] sm:$0xff] %v458_v53  ;;  %v522_v53 = vld [vmem:[%s1346_s6 + $0x3a8] sm:$0xff] }
  0xcc   : > { %587 = vst [vmem:[%s1356_s17 + $0x368] sm:$0xff] %v459_v54  ;;  %v523_v54 = vld [vmem:[%s1346_s6 + $0x3b0] sm:$0xff] }
  0xcd   : > { %588 = vst [vmem:[%s1356_s17 + $0x370] sm:$0xff] %v460_v55  ;;  %v524_v55 = vld [vmem:[%s1346_s6 + $0x3b8] sm:$0xff] }
  0xce   : > { %589 = vst [vmem:[%s1356_s17 + $0x388] sm:$0xff] %v461_v56  ;;  %v525_v56 = vld [vmem:[%s1346_s6 + $0x3c0] sm:$0xff] }
  0xcf   : > { %590 = vst [vmem:[%s1356_s17 + $0x390] sm:$0xff] %v462_v57  ;;  %v526_v57 = vld [vmem:[%s1346_s6 + $0x3c8] sm:$0xff] }
  0xd0   : > { %591 = vst [vmem:[%s1356_s17 + $0x3a8] sm:$0xff] %v463_v58  ;;  %v527_v58 = vld [vmem:[%s1346_s6 + $0x3d0] sm:$0xff] }
  0xd1   : > { %592 = vst [vmem:[%s1356_s17 + $0x3b0] sm:$0xff] %v464_v59  ;;  %v528_v59 = vld [vmem:[%s1346_s6 + $0x3d8] sm:$0xff] }
  0xd2   : > { %593 = vst [vmem:[%s1356_s17 + $0x3c8] sm:$0xff] %v465_v60  ;;  %v529_v60 = vld [vmem:[%s1346_s6 + $0x3e0] sm:$0xff] }
  0xd3   : > { %594 = vst [vmem:[%s1356_s17 + $0x3d0] sm:$0xff] %v466_v61  ;;  %v530_v61 = vld [vmem:[%s1346_s6 + $0x3e8] sm:$0xff] }
  0xd4   : > { %595 = vst [vmem:[%s1356_s17 + $0x3e8] sm:$0xff] %v467_v62  ;;  %v531_v62 = vld [vmem:[%s1346_s6 + $0x3f0] sm:$0xff] }
  0xd5   : > { %596 = vst [vmem:[%s1356_s17 + $0x3f0] sm:$0xff] %v468_v63  ;;  %v532_v63 = vld [vmem:[%s1346_s6 + $0x3f8] sm:$0xff] }
  0xd6   : > { %597 = vst [vmem:[%s1356_s17 + $0x408] sm:$0xff] %v469_v0  ;;  %v661_v0 = vld [vmem:[%s1739_s22] sm:$0xff] }
  0xd7   : > { %598 = vst [vmem:[%s1356_s17 + $0x410] sm:$0xff] %v470_v1  ;;  %v662_v1 = vld [vmem:[%s1739_s22 + $0x8] sm:$0xff] }
  0xd8   : > { %599 = vst [vmem:[%s1356_s17 + $0x428] sm:$0xff] %v471_v2  ;;  %v663_v2 = vld [vmem:[%s1739_s22 + $0x10] sm:$0xff] }
  0xd9   : > { %600 = vst [vmem:[%s1356_s17 + $0x430] sm:$0xff] %v472_v3  ;;  %v664_v3 = vld [vmem:[%s1739_s22 + $0x18] sm:$0xff] }
  0xda   : > { %601 = vst [vmem:[%s1356_s17 + $0x448] sm:$0xff] %v473_v4  ;;  %v665_v4 = vld [vmem:[%s1739_s22 + $0x20] sm:$0xff] }
  0xdb   : > { %602 = vst [vmem:[%s1356_s17 + $0x450] sm:$0xff] %v474_v5  ;;  %v666_v5 = vld [vmem:[%s1739_s22 + $0x28] sm:$0xff] }
  0xdc   : > { %603 = vst [vmem:[%s1356_s17 + $0x468] sm:$0xff] %v475_v6  ;;  %v667_v6 = vld [vmem:[%s1739_s22 + $0x30] sm:$0xff] }
  0xdd   : > { %604 = vst [vmem:[%s1356_s17 + $0x470] sm:$0xff] %v476_v7  ;;  %v668_v7 = vld [vmem:[%s1739_s22 + $0x38] sm:$0xff] }
  0xde   : > { %605 = vst [vmem:[%s1356_s17 + $0x488] sm:$0xff] %v477_v8  ;;  %v669_v8 = vld [vmem:[%s1739_s22 + $0x40] sm:$0xff] }
  0xdf   : > { %606 = vst [vmem:[%s1356_s17 + $0x490] sm:$0xff] %v478_v9  ;;  %v670_v9 = vld [vmem:[%s1739_s22 + $0x48] sm:$0xff] }
  0xe0   : > { %607 = vst [vmem:[%s1356_s17 + $0x4a8] sm:$0xff] %v479_v10  ;;  %v671_v10 = vld [vmem:[%s1739_s22 + $0x50] sm:$0xff] }
  0xe1   : > { %608 = vst [vmem:[%s1356_s17 + $0x4b0] sm:$0xff] %v480_v11  ;;  %v672_v11 = vld [vmem:[%s1739_s22 + $0x58] sm:$0xff] }
  0xe2   : > { %609 = vst [vmem:[%s1356_s17 + $0x4c8] sm:$0xff] %v481_v12  ;;  %v673_v12 = vld [vmem:[%s1739_s22 + $0x60] sm:$0xff] }
  0xe3   : > { %610 = vst [vmem:[%s1356_s17 + $0x4d0] sm:$0xff] %v482_v13  ;;  %v674_v13 = vld [vmem:[%s1739_s22 + $0x68] sm:$0xff] }
  0xe4   : > { %611 = vst [vmem:[%s1356_s17 + $0x4e8] sm:$0xff] %v483_v14  ;;  %v675_v14 = vld [vmem:[%s1739_s22 + $0x70] sm:$0xff] }
  0xe5   : > { %612 = vst [vmem:[%s1356_s17 + $0x4f0] sm:$0xff] %v484_v15  ;;  %v676_v15 = vld [vmem:[%s1739_s22 + $0x78] sm:$0xff] }
  0xe6   : > { %613 = vst [vmem:[%s1356_s17 + $0x508] sm:$0xff] %v485_v16  ;;  %v677_v16 = vld [vmem:[%s1739_s22 + $0x80] sm:$0xff] }
  0xe7   : > { %614 = vst [vmem:[%s1356_s17 + $0x510] sm:$0xff] %v486_v17  ;;  %v678_v17 = vld [vmem:[%s1739_s22 + $0x88] sm:$0xff] }
  0xe8   : > { %615 = vst [vmem:[%s1356_s17 + $0x528] sm:$0xff] %v487_v18  ;;  %v679_v18 = vld [vmem:[%s1739_s22 + $0x90] sm:$0xff] }
  0xe9   : > { %616 = vst [vmem:[%s1356_s17 + $0x530] sm:$0xff] %v488_v19  ;;  %v680_v19 = vld [vmem:[%s1739_s22 + $0x98] sm:$0xff] }
  0xea   : > { %617 = vst [vmem:[%s1356_s17 + $0x548] sm:$0xff] %v489_v20  ;;  %v681_v20 = vld [vmem:[%s1739_s22 + $0xa0] sm:$0xff] }
  0xeb   : > { %618 = vst [vmem:[%s1356_s17 + $0x550] sm:$0xff] %v490_v21  ;;  %v682_v21 = vld [vmem:[%s1739_s22 + $0xa8] sm:$0xff] }
  0xec   : > { %619 = vst [vmem:[%s1356_s17 + $0x568] sm:$0xff] %v491_v22  ;;  %v683_v22 = vld [vmem:[%s1739_s22 + $0xb0] sm:$0xff] }
  0xed   : > { %620 = vst [vmem:[%s1356_s17 + $0x570] sm:$0xff] %v492_v23  ;;  %v684_v23 = vld [vmem:[%s1739_s22 + $0xb8] sm:$0xff] }
  0xee   : > { %621 = vst [vmem:[%s1356_s17 + $0x588] sm:$0xff] %v493_v24  ;;  %v685_v24 = vld [vmem:[%s1739_s22 + $0xc0] sm:$0xff] }
  0xef   : > { %622 = vst [vmem:[%s1356_s17 + $0x590] sm:$0xff] %v494_v25  ;;  %v686_v25 = vld [vmem:[%s1739_s22 + $0xc8] sm:$0xff] }
  0xf0   : > { %623 = vst [vmem:[%s1356_s17 + $0x5a8] sm:$0xff] %v495_v26  ;;  %v687_v26 = vld [vmem:[%s1739_s22 + $0xd0] sm:$0xff] }
  0xf1   : > { %624 = vst [vmem:[%s1356_s17 + $0x5b0] sm:$0xff] %v496_v27  ;;  %v688_v27 = vld [vmem:[%s1739_s22 + $0xd8] sm:$0xff] }
  0xf2   : > { %625 = vst [vmem:[%s1356_s17 + $0x5c8] sm:$0xff] %v497_v28  ;;  %v689_v28 = vld [vmem:[%s1739_s22 + $0xe0] sm:$0xff] }
  0xf3   : > { %626 = vst [vmem:[%s1356_s17 + $0x5d0] sm:$0xff] %v498_v29  ;;  %v690_v29 = vld [vmem:[%s1739_s22 + $0xe8] sm:$0xff] }
  0xf4   : > { %627 = vst [vmem:[%s1356_s17 + $0x5e8] sm:$0xff] %v499_v30  ;;  %v691_v30 = vld [vmem:[%s1739_s22 + $0xf0] sm:$0xff] }
  0xf5   : > { %628 = vst [vmem:[%s1356_s17 + $0x5f0] sm:$0xff] %v500_v31  ;;  %v692_v31 = vld [vmem:[%s1739_s22 + $0xf8] sm:$0xff] }
  0xf6   : > { %629 = vst [vmem:[%s1356_s17 + $0x608] sm:$0xff] %v501_v32  ;;  %v693_v32 = vld [vmem:[%s1739_s22 + $0x100] sm:$0xff] }
  0xf7   : > { %630 = vst [vmem:[%s1356_s17 + $0x610] sm:$0xff] %v502_v33  ;;  %v694_v33 = vld [vmem:[%s1739_s22 + $0x108] sm:$0xff] }
  0xf8   : > { %631 = vst [vmem:[%s1356_s17 + $0x628] sm:$0xff] %v503_v34  ;;  %v695_v34 = vld [vmem:[%s1739_s22 + $0x110] sm:$0xff] }
  0xf9   : > { %632 = vst [vmem:[%s1356_s17 + $0x630] sm:$0xff] %v504_v35  ;;  %v696_v35 = vld [vmem:[%s1739_s22 + $0x118] sm:$0xff] }
  0xfa   : > { %633 = vst [vmem:[%s1356_s17 + $0x648] sm:$0xff] %v505_v36  ;;  %v697_v36 = vld [vmem:[%s1739_s22 + $0x120] sm:$0xff] }
  0xfb   : > { %634 = vst [vmem:[%s1356_s17 + $0x650] sm:$0xff] %v506_v37  ;;  %v698_v37 = vld [vmem:[%s1739_s22 + $0x128] sm:$0xff] }
  0xfc   : > { %635 = vst [vmem:[%s1356_s17 + $0x668] sm:$0xff] %v507_v38  ;;  %v699_v38 = vld [vmem:[%s1739_s22 + $0x130] sm:$0xff] }
  0xfd   : > { %636 = vst [vmem:[%s1356_s17 + $0x670] sm:$0xff] %v508_v39  ;;  %v700_v39 = vld [vmem:[%s1739_s22 + $0x138] sm:$0xff] }
  0xfe   : > { %637 = vst [vmem:[%s1356_s17 + $0x688] sm:$0xff] %v509_v40  ;;  %v701_v40 = vld [vmem:[%s1739_s22 + $0x140] sm:$0xff] }
  0xff   : > { %638 = vst [vmem:[%s1356_s17 + $0x690] sm:$0xff] %v510_v41  ;;  %v702_v41 = vld [vmem:[%s1739_s22 + $0x148] sm:$0xff] }
 0x100   : > { %639 = vst [vmem:[%s1356_s17 + $0x6a8] sm:$0xff] %v511_v42  ;;  %v703_v42 = vld [vmem:[%s1739_s22 + $0x150] sm:$0xff] }
 0x101   : > { %640 = vst [vmem:[%s1356_s17 + $0x6b0] sm:$0xff] %v512_v43  ;;  %v704_v43 = vld [vmem:[%s1739_s22 + $0x158] sm:$0xff] }
 0x102   : > { %641 = vst [vmem:[%s1356_s17 + $0x6c8] sm:$0xff] %v513_v44  ;;  %v705_v44 = vld [vmem:[%s1739_s22 + $0x160] sm:$0xff] }
 0x103   : > { %642 = vst [vmem:[%s1356_s17 + $0x6d0] sm:$0xff] %v514_v45  ;;  %v706_v45 = vld [vmem:[%s1739_s22 + $0x168] sm:$0xff] }
 0x104   : > { %643 = vst [vmem:[%s1356_s17 + $0x6e8] sm:$0xff] %v515_v46  ;;  %v707_v46 = vld [vmem:[%s1739_s22 + $0x170] sm:$0xff] }
 0x105   : > { %644 = vst [vmem:[%s1356_s17 + $0x6f0] sm:$0xff] %v516_v47  ;;  %v708_v47 = vld [vmem:[%s1739_s22 + $0x178] sm:$0xff] }
 0x106   : > { %645 = vst [vmem:[%s1356_s17 + $0x708] sm:$0xff] %v517_v48  ;;  %v709_v48 = vld [vmem:[%s1739_s22 + $0x180] sm:$0xff] }
 0x107   : > { %646 = vst [vmem:[%s1356_s17 + $0x710] sm:$0xff] %v518_v49  ;;  %v710_v49 = vld [vmem:[%s1739_s22 + $0x188] sm:$0xff] }
 0x108   : > { %647 = vst [vmem:[%s1356_s17 + $0x728] sm:$0xff] %v519_v50  ;;  %v711_v50 = vld [vmem:[%s1739_s22 + $0x190] sm:$0xff] }
 0x109   : > { %648 = vst [vmem:[%s1356_s17 + $0x730] sm:$0xff] %v520_v51  ;;  %v712_v51 = vld [vmem:[%s1739_s22 + $0x198] sm:$0xff] }
 0x10a   : > { %649 = vst [vmem:[%s1356_s17 + $0x748] sm:$0xff] %v521_v52  ;;  %v713_v52 = vld [vmem:[%s1739_s22 + $0x1a0] sm:$0xff] }
 0x10b   : > { %650 = vst [vmem:[%s1356_s17 + $0x750] sm:$0xff] %v522_v53  ;;  %v714_v53 = vld [vmem:[%s1739_s22 + $0x1a8] sm:$0xff] }
 0x10c   : > { %651 = vst [vmem:[%s1356_s17 + $0x768] sm:$0xff] %v523_v54  ;;  %v715_v54 = vld [vmem:[%s1739_s22 + $0x1b0] sm:$0xff] }
 0x10d   : > { %652 = vst [vmem:[%s1356_s17 + $0x770] sm:$0xff] %v524_v55  ;;  %v716_v55 = vld [vmem:[%s1739_s22 + $0x1b8] sm:$0xff] }
 0x10e   : > { %653 = vst [vmem:[%s1356_s17 + $0x788] sm:$0xff] %v525_v56  ;;  %v717_v56 = vld [vmem:[%s1739_s22 + $0x1c0] sm:$0xff] }
 0x10f   : > { %654 = vst [vmem:[%s1356_s17 + $0x790] sm:$0xff] %v526_v57  ;;  %v718_v57 = vld [vmem:[%s1739_s22 + $0x1c8] sm:$0xff] }
 0x110   : > { %655 = vst [vmem:[%s1356_s17 + $0x7a8] sm:$0xff] %v527_v58  ;;  %v719_v58 = vld [vmem:[%s1739_s22 + $0x1d0] sm:$0xff] }
 0x111   : > { %656 = vst [vmem:[%s1356_s17 + $0x7b0] sm:$0xff] %v528_v59  ;;  %v720_v59 = vld [vmem:[%s1739_s22 + $0x1d8] sm:$0xff] }
 0x112   : > { %657 = vst [vmem:[%s1356_s17 + $0x7c8] sm:$0xff] %v529_v60  ;;  %v721_v60 = vld [vmem:[%s1739_s22 + $0x1e0] sm:$0xff] }
 0x113   : > { %658 = vst [vmem:[%s1356_s17 + $0x7d0] sm:$0xff] %v530_v61  ;;  %v722_v61 = vld [vmem:[%s1739_s22 + $0x1e8] sm:$0xff] }
 0x114   : > { %659 = vst [vmem:[%s1356_s17 + $0x7e8] sm:$0xff] %v531_v62  ;;  %v723_v62 = vld [vmem:[%s1739_s22 + $0x1f0] sm:$0xff] }
 0x115   : > { %660 = vst [vmem:[%s1356_s17 + $0x7f0] sm:$0xff] %v532_v63  ;;  %v724_v63 = vld [vmem:[%s1739_s22 + $0x1f8] sm:$0xff] }
 0x116   : > { %725 = vst [vmem:[%s1356_s17 + $0x18] sm:$0xff] %v661_v0 }
 0x117   : > { %726 = vst [vmem:[%s1356_s17 + $0x38] sm:$0xff] %v662_v1 }
 0x118   : > { %727 = vst [vmem:[%s1356_s17 + $0x58] sm:$0xff] %v663_v2 }
 0x119   : > { %728 = vst [vmem:[%s1356_s17 + $0x78] sm:$0xff] %v664_v3 }
 0x11a   : > { %729 = vst [vmem:[%s1356_s17 + $0x98] sm:$0xff] %v665_v4 }
 0x11b   : > { %730 = vst [vmem:[%s1356_s17 + $0xb8] sm:$0xff] %v666_v5 }
 0x11c   : > { %731 = vst [vmem:[%s1356_s17 + $0xd8] sm:$0xff] %v667_v6 }
 0x11d   : > { %732 = vst [vmem:[%s1356_s17 + $0xf8] sm:$0xff] %v668_v7 }
 0x11e   : > { %733 = vst [vmem:[%s1356_s17 + $0x118] sm:$0xff] %v669_v8 }
 0x11f   : > { %734 = vst [vmem:[%s1356_s17 + $0x138] sm:$0xff] %v670_v9 }
 0x120   : > { %735 = vst [vmem:[%s1356_s17 + $0x158] sm:$0xff] %v671_v10 }
 0x121   : > { %736 = vst [vmem:[%s1356_s17 + $0x178] sm:$0xff] %v672_v11 }
 0x122   : > { %737 = vst [vmem:[%s1356_s17 + $0x198] sm:$0xff] %v673_v12 }
 0x123   : > { %738 = vst [vmem:[%s1356_s17 + $0x1b8] sm:$0xff] %v674_v13 }
 0x124   : > { %739 = vst [vmem:[%s1356_s17 + $0x1d8] sm:$0xff] %v675_v14 }
 0x125   : > { %740 = vst [vmem:[%s1356_s17 + $0x1f8] sm:$0xff] %v676_v15 }
 0x126   : > { %741 = vst [vmem:[%s1356_s17 + $0x218] sm:$0xff] %v677_v16 }
 0x127   : > { %742 = vst [vmem:[%s1356_s17 + $0x238] sm:$0xff] %v678_v17 }
 0x128   : > { %743 = vst [vmem:[%s1356_s17 + $0x258] sm:$0xff] %v679_v18 }
 0x129   : > { %744 = vst [vmem:[%s1356_s17 + $0x278] sm:$0xff] %v680_v19 }
 0x12a   : > { %745 = vst [vmem:[%s1356_s17 + $0x298] sm:$0xff] %v681_v20 }
 0x12b   : > { %746 = vst [vmem:[%s1356_s17 + $0x2b8] sm:$0xff] %v682_v21 }
 0x12c   : > { %747 = vst [vmem:[%s1356_s17 + $0x2d8] sm:$0xff] %v683_v22 }
 0x12d   : > { %748 = vst [vmem:[%s1356_s17 + $0x2f8] sm:$0xff] %v684_v23 }
 0x12e   : > { %749 = vst [vmem:[%s1356_s17 + $0x318] sm:$0xff] %v685_v24 }
 0x12f   : > { %750 = vst [vmem:[%s1356_s17 + $0x338] sm:$0xff] %v686_v25 }
 0x130   : > { %751 = vst [vmem:[%s1356_s17 + $0x358] sm:$0xff] %v687_v26 }
 0x131   : > { %752 = vst [vmem:[%s1356_s17 + $0x378] sm:$0xff] %v688_v27 }
 0x132   : > { %753 = vst [vmem:[%s1356_s17 + $0x398] sm:$0xff] %v689_v28 }
 0x133   : > { %754 = vst [vmem:[%s1356_s17 + $0x3b8] sm:$0xff] %v690_v29 }
 0x134   : > { %755 = vst [vmem:[%s1356_s17 + $0x3d8] sm:$0xff] %v691_v30 }
 0x135   : > { %756 = vst [vmem:[%s1356_s17 + $0x3f8] sm:$0xff] %v692_v31 }
 0x136   : > { %757 = vst [vmem:[%s1356_s17 + $0x418] sm:$0xff] %v693_v32 }
 0x137   : > { %758 = vst [vmem:[%s1356_s17 + $0x438] sm:$0xff] %v694_v33 }
 0x138   : > { %759 = vst [vmem:[%s1356_s17 + $0x458] sm:$0xff] %v695_v34 }
 0x139   : > { %760 = vst [vmem:[%s1356_s17 + $0x478] sm:$0xff] %v696_v35 }
 0x13a   : > { %761 = vst [vmem:[%s1356_s17 + $0x498] sm:$0xff] %v697_v36 }
 0x13b   : > { %762 = vst [vmem:[%s1356_s17 + $0x4b8] sm:$0xff] %v698_v37 }
 0x13c   : > { %763 = vst [vmem:[%s1356_s17 + $0x4d8] sm:$0xff] %v699_v38 }
 0x13d   : > { %764 = vst [vmem:[%s1356_s17 + $0x4f8] sm:$0xff] %v700_v39 }
 0x13e   : > { %765 = vst [vmem:[%s1356_s17 + $0x518] sm:$0xff] %v701_v40 }
 0x13f   : > { %766 = vst [vmem:[%s1356_s17 + $0x538] sm:$0xff] %v702_v41 }
 0x140   : > { %767 = vst [vmem:[%s1356_s17 + $0x558] sm:$0xff] %v703_v42 }
 0x141   : > { %768 = vst [vmem:[%s1356_s17 + $0x578] sm:$0xff] %v704_v43 }
 0x142   : > { %769 = vst [vmem:[%s1356_s17 + $0x598] sm:$0xff] %v705_v44 }
 0x143   : > { %770 = vst [vmem:[%s1356_s17 + $0x5b8] sm:$0xff] %v706_v45 }
 0x144   : > { %771 = vst [vmem:[%s1356_s17 + $0x5d8] sm:$0xff] %v707_v46 }
 0x145   : > { %772 = vst [vmem:[%s1356_s17 + $0x5f8] sm:$0xff] %v708_v47 }
 0x146   : > { %773 = vst [vmem:[%s1356_s17 + $0x618] sm:$0xff] %v709_v48 }
 0x147   : > { %774 = vst [vmem:[%s1356_s17 + $0x638] sm:$0xff] %v710_v49 }
 0x148   : > { %775 = vst [vmem:[%s1356_s17 + $0x658] sm:$0xff] %v711_v50 }
 0x149   : > { %776 = vst [vmem:[%s1356_s17 + $0x678] sm:$0xff] %v712_v51 }
 0x14a   : > { %777 = vst [vmem:[%s1356_s17 + $0x698] sm:$0xff] %v713_v52 }
 0x14b   : > { %778 = vst [vmem:[%s1356_s17 + $0x6b8] sm:$0xff] %v714_v53 }
 0x14c   : > { %779 = vst [vmem:[%s1356_s17 + $0x6d8] sm:$0xff] %v715_v54 }
 0x14d   : > { %780 = vst [vmem:[%s1356_s17 + $0x6f8] sm:$0xff] %v716_v55 }
 0x14e   : > { %781 = vst [vmem:[%s1356_s17 + $0x718] sm:$0xff] %v717_v56 }
 0x14f   : > { %782 = vst [vmem:[%s1356_s17 + $0x738] sm:$0xff] %v718_v57 }
 0x150   : > { %783 = vst [vmem:[%s1356_s17 + $0x758] sm:$0xff] %v719_v58 }
 0x151   : > { %784 = vst [vmem:[%s1356_s17 + $0x778] sm:$0xff] %v720_v59 }
 0x152   : > { %785 = vst [vmem:[%s1356_s17 + $0x798] sm:$0xff] %v721_v60 }
 0x153   : > { %786 = vst [vmem:[%s1356_s17 + $0x7b8] sm:$0xff] %v722_v61 }
 0x154   : > { %787 = vst [vmem:[%s1356_s17 + $0x7d8] sm:$0xff] %v723_v62 }
 0x155   : > { %788 = vst [vmem:[%s1356_s17 + $0x7f8] sm:$0xff] %v724_v63 }
 0x156   : > { %1131 = shalt.err (!%p1128_p5)
}
 0x157   : > { %s1180_s14 = smov 512   ;;  %s1181_s7 = smov 32  }
 0x158   : > { %958 = dma.vmem_to_hbm [thread:$0]  (%p1248_p11), %s804_s16, 32768, %s806_s8, %s790_s29, %s1180_s14, %s1180_s14, %s1181_s7  }
 0x159 PF: > { %s820_s18 = sand.u32 1, %s1162_s12   ;;  %p971_p7 = pnand %p924_p9, %p1252_p12 }
 0x15a   : > { %s821_s26 = scalar_lea.sflag [#allocation4], %s820_s18 }
 0x15b   : > { %p972_p8 = pneg %p971_p7 }
 0x15d   : > { %1157 = dma.done.wait (%p972_p8), %s821_s26, 32768  }
 0x15e   : > { %1159 = vsyncadd (%p972_p8), %s821_s26, 4294934528  ;;  %s1924_s15 = sld [smem:[#allocation13_spill]]  ;;  %s1927_s12 = smov %s1166_s13 }
 0x15f   : > { %s1925_s9 = sld [smem:[#allocation12_spill]] }
 0x160   : > { %s1926_s14 = sld [smem:[#allocation14_spill]] }
 0x164   : > { %p19_p10 = scmp.ge.s32.totalorder %s1924_s15, 4  }
 0x165   : > { %s1928_s13 = smov %s1925_s9 }
 0x166   :  { %21 = sbr.rel (!%p19_p10) target bundleno = 9 (0x9), region = 101 }
 0x16b   :  { %827 = vsyncpa [#allocation3], 1 }
 0x16c   :  { %829 = vsyncpa [#allocation3 + $0x1], 1 }
 0x16d   :  { %830 = vsyncpa [#allocation6], 1 }
 0x16e   :  { %832 = vsyncpa [#allocation6 + $0x1], 1 }
 0x16f   :  { %833 = vsyncpa [#allocation4], 1 }
 0x170   :  { %835 = vsyncpa [#allocation4 + $0x1], 1 }

</bundles_post_ra>
